<compile_context>
chip_gen: v6e
topology: v6e:2x2x1
jax: 0.10.0
libtpu: 0.0.40
codegen_flags: <defaults>
</compile_context>

<pallas_src>
import functools

import numpy as np
import jax
import jax.numpy as jnp
from jax.experimental import pallas as pl
from jax.experimental.pallas import tpu as pltpu


# --------------------------------------------------------------------------- #
# Parameter preparation (one-time, outside the kernel)
# --------------------------------------------------------------------------- #
def init_block_params(key, planes):
    """Deterministic parameters matching the PyTorch Block layer shapes."""
    ks = jax.random.split(key, 10)
    fan1 = 3 * 7 * 7
    fan2 = planes * 3 * 3
    conv1_w = jax.random.normal(ks[0], (planes, 3, 7, 7), jnp.float32) * np.sqrt(2.0 / fan1)
    conv2_w = jax.random.normal(ks[1], (planes, planes, 3, 3), jnp.float32) * np.sqrt(2.0 / fan2)
    bn1 = (jax.random.uniform(ks[2], (planes,), jnp.float32, 0.5, 1.5),   # gamma
           jax.random.uniform(ks[3], (planes,), jnp.float32, -0.2, 0.2),  # beta
           0.1 * jax.random.normal(ks[4], (planes,), jnp.float32),        # running_mean
           jax.random.uniform(ks[5], (planes,), jnp.float32, 0.5, 1.5))   # running_var
    bn2 = (jax.random.uniform(ks[6], (planes,), jnp.float32, 0.5, 1.5),
           jax.random.uniform(ks[7], (planes,), jnp.float32, -0.2, 0.2),
           0.1 * jax.random.normal(ks[8], (planes,), jnp.float32),
           jax.random.uniform(ks[9], (planes,), jnp.float32, 0.5, 1.5))
    return {"conv1_w": conv1_w, "conv2_w": conv2_w, "bn1": bn1, "bn2": bn2}


def prepare_block_params(params, eps=1e-5):
    """Fold eval-mode BN into the conv weights and repack them as matmul panels."""
    w1 = np.asarray(params["conv1_w"], np.float32)          # [P, 3, 7, 7]
    w2 = np.asarray(params["conv2_w"], np.float32)          # [P, P, 3, 3]
    g1, be1, m1, v1 = (np.asarray(a, np.float32) for a in params["bn1"])
    g2, be2, m2, v2 = (np.asarray(a, np.float32) for a in params["bn2"])
    planes = w1.shape[0]

    s1 = g1 / np.sqrt(v1 + eps)
    b1 = be1 - m1 * s1
    s2 = g2 / np.sqrt(v2 + eps)
    b2 = be2 - m2 * s2

    # conv1 (7x7, stride 2, pad 3): for each output parity (ph, pw) a 3x3
    # stride-1 conv over the space-to-depth(4) input (48 channels). Packed as
    # ONE matmul panel:  K = (3x3 tap)*(48 ch) = 432,
    #                    N = (pw*2 + ph)*planes + cout = 4*planes.
    wt = np.transpose(w1, (2, 3, 1, 0))                      # [kh, kw, cin, cout]
    w1s = np.zeros((2, 2, 3, 3, 4, 4, 3, planes), np.float32)  # [ph,pw,a,b,rh,rw,cin,cout]
    for ph in range(2):
        for kh in range(7):
            a, rh = divmod(2 * ph + kh + 1, 4)               # a in 0..2, rh in 0..3
            for pw in range(2):
                for kw in range(7):
                    b, rw = divmod(2 * pw + kw + 1, 4)
                    w1s[ph, pw, a, b, rh, rw] = wt[kh, kw]
    w1s = w1s * s1                                           # fold BN1 scale (per cout)
    # -> [a, b, rh, rw, cin, pw, ph, cout] -> [432, 4*planes]
    w1m = np.transpose(w1s, (2, 3, 4, 5, 6, 1, 0, 7)).reshape(9 * 48, 4 * planes)
    b1m = np.tile(b1, 4).reshape(1, 4 * planes)

    # conv2 (3x3, stride 1, pad 1) with BN2 folded, one [P, P] panel per tap.
    w2m = (np.transpose(w2, (2, 3, 1, 0)) * s2).reshape(9, planes, planes)
    b2m = b2.reshape(1, planes)

    # conv1 weights as bf16 (MXU-native, f32 accumulation); conv2 weights stay
    # f32: after the GAP fusion that matmul is tiny, so f32 is free and keeps
    # the end-to-end error comfortably inside 1e-2.
    return (jnp.asarray(w1m, jnp.bfloat16), jnp.asarray(b1m, jnp.float32),
            jnp.asarray(w2m, jnp.float32), jnp.asarray(b2m, jnp.float32))


# --------------------------------------------------------------------------- #
# The fused kernel
# --------------------------------------------------------------------------- #
def _block_kernel(x_ref, w1_ref, b1_ref, w2_ref, b2_ref, o_ref, pool_ref,
                  *, bb, hq, wq, planes):
    # x_ref:    [bb, hq*wq, 432]  bf16  conv1 im2col (space-to-depth parity form)
    # w1_ref:   [432, 4*planes]   bf16  conv1 (+bn1) panel, parities on N
    # b1_ref:   [1, 4*planes]     f32
    # w2_ref:   [9, planes, planes] f32 conv2 (+bn2), one panel per tap
    # b2_ref:   [1, planes]       f32
    # o_ref:    [bb, 1, planes]   f32   global-average-pooled output
    # pool_ref: VMEM [bb, hq+1, wq+1, 4*planes] f32  conv1 output + zero border
    P = planes
    f32 = jnp.float32
    nsp = hq * wq

    # Zero only the 1-wide borders that the shifted maxpool reads touch.
    # (Interior is fully overwritten every step; redoing the border each step
    #  is cheap and stays correct if the parallel grid axis is split across
    #  TensorCores, unlike a program_id == 0 guard.)
    pool_ref[:, 0:1, :, :] = jnp.zeros((bb, 1, wq + 1, 4 * P), f32)
    pool_ref[:, :, 0:1, :] = jnp.zeros((bb, hq + 1, 1, 4 * P), f32)

    # ---- conv1 (7x7/s2/p3) + bn1 + relu: ONE MXU matmul ---------------------
    # Taps + input channels on K (im2col done in the wrapper), the 4 output
    # parities on N, so bias + ReLU are lane-dense over 4*planes lanes.
    z = jnp.dot(x_ref[...].reshape(bb * nsp, 9 * 48), w1_ref[...],
                preferred_element_type=f32)
    z = jnp.maximum(z + b1_ref[...], 0.0).reshape(bb, hq, wq, 4 * P)

    # Stash for the shifted (row-1 / col-1) maxpool windows (lane-dense store).
    pool_ref[:, 1:1 + hq, 1:1 + wq, :] = z

    # ---- maxpool 3x3/s2/p1 ---------------------------------------------------
    # Output (j, l) covers conv1 rows {2j-1, 2j, 2j+1} x cols {2l-1, 2l, 2l+1};
    # parity lane block pidx = pw*2 + ph. Zero padding is exact post-ReLU.
    def blk(v, pidx):
        return v[..., pidx * P:(pidx + 1) * P]

    m = jnp.maximum(jnp.maximum(blk(z, 0), blk(z, 1)),
                    jnp.maximum(blk(z, 2), blk(z, 3)))        # q=j,   r=l
    w10 = pool_ref[:, 1:1 + hq, 0:wq, :]                      # q=j,   r=l-1 (pw=1)
    m = jnp.maximum(m, jnp.maximum(blk(w10, 2), blk(w10, 3)))
    w01 = pool_ref[:, 0:hq, 1:1 + wq, :]                      # q=j-1, r=l   (ph=1)
    m = jnp.maximum(m, jnp.maximum(blk(w01, 1), blk(w01, 3)))
    w00 = pool_ref[:, 0:hq, 0:wq, :]                          # q=j-1, r=l-1 (ph=pw=1)
    pooled = jnp.maximum(m, blk(w00, 3))                      # [bb, hq, wq, P]

    # ---- conv2 (3x3/s1/p1) + bn2 + global average pool, fused ----------------
    # GAP(conv2(p)) = (1/nsp) * sum_t (spatial sum of tap t of p) @ W2[t] + b2;
    # the spatial sum of tap (a, b) is a sum of `pooled` over a cropped
    # rectangle (the conv zero padding contributes nothing).
    acc = None
    for a in range(3):
        r0, r1 = max(0, a - 1), min(hq, hq + a - 1)
        for b in range(3):
            c0, c1 = max(0, b - 1), min(wq, wq + b - 1)
            s = jnp.sum(pooled[:, r0:r1, c0:c1, :], axis=(1, 2))       # [bb, P]
            d = jnp.dot(s, w2_ref[a * 3 + b], preferred_element_type=f32)
            acc = d if acc is None else acc + d
    y = acc * (1.0 / nsp) + b2_ref[...]                                # [bb, P]
    o_ref[...] = y.reshape(bb, 1, P).astype(o_ref.dtype)


def _pick_block_batch(n, nsp):
    """Images per grid step: target M = bb*nsp >= 128 MXU rows, but keep at
    least 2 grid steps when n >= 2 so both v7x TensorCores get work."""
    target = max(1, -(-128 // nsp))
    divisors = [d for d in range(1, n + 1) if n % d == 0]
    bb = max([d for d in divisors if d <= target] or [1])
    while bb > 1 and n // bb < 2:
        bb = max([d for d in divisors if d < bb] or [1])
    return bb


def block_forward(x, w1, b1, w2, b2, *, planes, block_batch=None):
    n, c, h, w = x.shape
    assert c == 3 and h % 4 == 0 and w % 4 == 0
    hq, wq = h // 4, w // 4
    nsp = hq * wq
    bb = block_batch if block_batch is not None else _pick_block_batch(n, nsp)
    assert n % bb == 0

    # Layout plumbing (outside the kernel, fused by XLA):
    # NCHW -> NHWC -> pad(4) -> space-to-depth(4) -> im2col over the 3x3
    # neighbourhood of 4x4 blocks: one [nsp, 9*48] bf16 operand per image.
    xt = jnp.transpose(x, (0, 2, 3, 1))
    xt = jnp.pad(xt, ((0, 0), (4, 4), (4, 4), (0, 0)))
    xt = xt.reshape(n, hq + 2, 4, wq + 2, 4, 3)
    x4p = jnp.transpose(xt, (0, 1, 3, 2, 4, 5)).reshape(n, hq + 2, wq + 2, 48)
    taps = [x4p[:, a:a + hq, b:b + wq, :] for a in range(3) for b in range(3)]
    xim = jnp.concatenate(taps, axis=-1).reshape(n, nsp, 9 * 48).astype(jnp.bfloat16)

    kernel = functools.partial(_block_kernel, bb=bb, hq=hq, wq=wq, planes=planes)
    out = pl.pallas_call(
        kernel,
        out_shape=jax.ShapeDtypeStruct((n, 1, planes), jnp.float32),
        grid_spec=pltpu.PrefetchScalarGridSpec(
            num_scalar_prefetch=0,
            grid=(n // bb,),
            in_specs=[
                pl.BlockSpec((bb, nsp, 9 * 48), lambda i: (i, 0, 0)),
                pl.BlockSpec((9 * 48, 4 * planes), lambda i: (0, 0)),
                pl.BlockSpec((1, 4 * planes), lambda i: (0, 0)),
                pl.BlockSpec((9, planes, planes), lambda i: (0, 0, 0)),
                pl.BlockSpec((1, planes), lambda i: (0, 0)),
            ],
            out_specs=pl.BlockSpec((bb, 1, planes), lambda i: (i, 0, 0)),
            scratch_shapes=[
                pltpu.VMEM((bb, hq + 1, wq + 1, 4 * planes), jnp.float32),
            ],
        ),
        compiler_params=pltpu.CompilerParams(
            dimension_semantics=("parallel",),
        ),
    )(xim, w1, b1, w2, b2)

    # PyTorch Block returns [N, planes, 1, 1].
    return out.reshape(n, planes, 1, 1)


# --------------------------------------------------------------------------- #
# Pure-JAX reference (eval-mode BN), for correctness checking
# --------------------------------------------------------------------------- #
def block_reference(x, params, eps=1e-5):
    w1 = params["conv1_w"]
    w2 = params["conv2_w"]
    g1, be1, m1, v1 = params["bn1"]
    g2, be2, m2, v2 = params["bn2"]
    dn = ("NCHW", "OIHW", "NCHW")

    y = jax.lax.conv_general_dilated(x, w1, (2, 2), ((3, 3), (3, 3)),
                                     dimension_numbers=dn,
                                     precision=jax.lax.Precision.HIGHEST)
    y = (y - m1[None, :, None, None]) * (g1 / jnp.sqrt(v1 + eps))[None, :, None, None] \
        + be1[None, :, None, None]
    y = jnp.maximum(y, 0.0)
    y = jax.lax.reduce_window(y, jnp.array(-jnp.inf, y.dtype), jax.lax.max,
                              (1, 1, 3, 3), (1, 1, 2, 2),
                              [(0, 0), (0, 0), (1, 1), (1, 1)])
    y = jax.lax.conv_general_dilated(y, w2, (1, 1), ((1, 1), (1, 1)),
                                     dimension_numbers=dn,
                                     precision=jax.lax.Precision.HIGHEST)
    y = (y - m2[None, :, None, None]) * (g2 / jnp.sqrt(v2 + eps))[None, :, None, None] \
        + be2[None, :, None, None]
    return jnp.mean(y, axis=(2, 3), keepdims=True)


if __name__ == "__main__":
    key = jax.random.PRNGKey(0)
    kx, kp = jax.random.split(key)

    batch, planes, height, width = 4, 64, 32, 32
    x = jax.random.normal(kx, (batch, 3, height, width), jnp.float32)
    params = init_block_params(kp, planes)

    # One-time parameter preparation (BN folding + matmul-panel weight layout).
    w1m, b1m, w2m, b2m = prepare_block_params(params)

    forward = jax.jit(functools.partial(block_forward, planes=planes))
    y = jax.block_until_ready(forward(x, w1m, b1m, w2m, b2m))

    y_ref = block_reference(x, params)
    assert y.shape == (batch, planes, 1, 1)
    err = float(jnp.max(jnp.abs(y - y_ref)))
    assert jnp.allclose(y, y_ref, atol=1e-2, rtol=1e-2), \
        f"mismatch vs reference (max abs err {err})"

    print("KERNEL_OK")
</pallas_src>

<mosaic_0001>
module attributes {stable_mosaic.version = 11 : i64} {
  func.func @_block_kernel(%arg0: i32, %arg1: memref<2x64x432xbf16, #tpu.memory_space<vmem>>, %arg2: memref<432x256xbf16, #tpu.memory_space<vmem>>, %arg3: memref<1x256xf32, #tpu.memory_space<vmem>>, %arg4: memref<9x64x64xf32, #tpu.memory_space<vmem>>, %arg5: memref<1x64xf32, #tpu.memory_space<vmem>>, %arg6: memref<2x1x64xf32, #tpu.memory_space<vmem>>, %arg7: memref<2x9x9x256xf32, #tpu.memory_space<vmem>>) attributes {dimension_semantics = [#tpu.dimension_semantics<parallel>], iteration_bounds = array<i64: 2>, scalar_prefetch = 0 : i64, scratch_operands = 1 : i64, tpu.core_type = #tpu.core_type<tc>, window_params = [{transform_indices = @transform_0, window_bounds = array<i64: 2, 64, 432>}, {pipeline_mode = #tpu.pipeline_mode<synchronous>, transform_indices = @transform_1, window_bounds = array<i64: 432, 256>}, {pipeline_mode = #tpu.pipeline_mode<synchronous>, transform_indices = @transform_2, window_bounds = array<i64: 1, 256>}, {pipeline_mode = #tpu.pipeline_mode<synchronous>, transform_indices = @transform_3, window_bounds = array<i64: 9, 64, 64>}, {pipeline_mode = #tpu.pipeline_mode<synchronous>, transform_indices = @transform_4, window_bounds = array<i64: 1, 64>}, {transform_indices = @transform_5, window_bounds = array<i64: 2, 1, 64>}]} {
    %cst = arith.constant 0.000000e+00 : f32
    %0 = vector.broadcast %cst : f32 to vector<2x1x9x256xf32>
    %c0 = arith.constant 0 : index
    %c0_0 = arith.constant 0 : index
    %c0_1 = arith.constant 0 : index
    %c0_2 = arith.constant 0 : index
    %1 = vector.load %arg7[%c0, %c0_0, %c0_1, %c0_2] : memref<2x9x9x256xf32, #tpu.memory_space<vmem>>, vector<2x1x9x256xf32>
    tpu.vector_store %arg7[%c0, %c0_0, %c0_1, %c0_2], %0 {strides = array<i32>} : memref<2x9x9x256xf32, #tpu.memory_space<vmem>>, vector<2x1x9x256xf32>,
    %cst_3 = arith.constant 0.000000e+00 : f32
    %2 = vector.broadcast %cst_3 : f32 to vector<2x9x1x256xf32>
    %c0_4 = arith.constant 0 : index
    %c0_5 = arith.constant 0 : index
    %c0_6 = arith.constant 0 : index
    %c0_7 = arith.constant 0 : index
    %3 = vector.load %arg7[%c0_4, %c0_5, %c0_6, %c0_7] : memref<2x9x9x256xf32, #tpu.memory_space<vmem>>, vector<2x9x1x256xf32>
    tpu.vector_store %arg7[%c0_4, %c0_5, %c0_6, %c0_7], %2 {strides = array<i32>} : memref<2x9x9x256xf32, #tpu.memory_space<vmem>>, vector<2x9x1x256xf32>,
    %c0_8 = arith.constant 0 : index
    %c0_9 = arith.constant 0 : index
    %c0_10 = arith.constant 0 : index
    %4 = vector.load %arg1[%c0_8, %c0_9, %c0_10] : memref<2x64x432xbf16, #tpu.memory_space<vmem>>, vector<2x64x432xbf16>
    %5 = vector.shape_cast %4 : vector<2x64x432xbf16> to vector<128x432xbf16>
    %c0_11 = arith.constant 0 : index
    %c0_12 = arith.constant 0 : index
    %6 = vector.load %arg2[%c0_11, %c0_12] : memref<432x256xbf16, #tpu.memory_space<vmem>>, vector<432x256xbf16>
    %cst_13 = arith.constant dense<0.000000e+00> : vector<128x256xf32>
    %7 = tpu.matmul %5, %6, %cst_13 {dimension_numbers = #tpu.dot_dimension_numbers<[1], [0], [0], [1], [0, 0, 1, 1], [], []>} : vector<128x432xbf16>, vector<432x256xbf16>, vector<128x256xf32> -> vector<128x256xf32>
    %c0_14 = arith.constant 0 : index
    %c0_15 = arith.constant 0 : index
    %8 = vector.load %arg3[%c0_14, %c0_15] : memref<1x256xf32, #tpu.memory_space<vmem>>, vector<1x256xf32>
    %9 = vector.broadcast %8 : vector<1x256xf32> to vector<128x256xf32>
    %10 = arith.addf %7, %9 : vector<128x256xf32>
    %cst_16 = arith.constant 0.000000e+00 : f32
    %11 = vector.broadcast %cst_16 : f32 to vector<128x256xf32>
    %12 = arith.maximumf %10, %11 : vector<128x256xf32>
    %13 = vector.shape_cast %12 : vector<128x256xf32> to vector<2x8x8x256xf32>
    %c0_17 = arith.constant 0 : index
    %c1 = arith.constant 1 : index
    %c1_18 = arith.constant 1 : index
    %c0_19 = arith.constant 0 : index
    %14 = vector.load %arg7[%c0_17, %c1, %c1_18, %c0_19] : memref<2x9x9x256xf32, #tpu.memory_space<vmem>>, vector<2x8x8x256xf32>
    tpu.vector_store %arg7[%c0_17, %c1, %c1_18, %c0_19], %13 {strides = array<i32>} : memref<2x9x9x256xf32, #tpu.memory_space<vmem>>, vector<2x8x8x256xf32>,
    %15 = vector.extract_strided_slice %13 {offsets = [0, 0, 0, 0], sizes = [2, 8, 8, 64], strides = [1, 1, 1, 1]} : vector<2x8x8x256xf32> to vector<2x8x8x64xf32>
    %16 = vector.extract_strided_slice %13 {offsets = [0, 0, 0, 64], sizes = [2, 8, 8, 64], strides = [1, 1, 1, 1]} : vector<2x8x8x256xf32> to vector<2x8x8x64xf32>
    %17 = arith.maximumf %15, %16 : vector<2x8x8x64xf32>
    %18 = vector.extract_strided_slice %13 {offsets = [0, 0, 0, 128], sizes = [2, 8, 8, 64], strides = [1, 1, 1, 1]} : vector<2x8x8x256xf32> to vector<2x8x8x64xf32>
    %19 = vector.extract_strided_slice %13 {offsets = [0, 0, 0, 192], sizes = [2, 8, 8, 64], strides = [1, 1, 1, 1]} : vector<2x8x8x256xf32> to vector<2x8x8x64xf32>
    %20 = arith.maximumf %18, %19 : vector<2x8x8x64xf32>
    %21 = arith.maximumf %17, %20 : vector<2x8x8x64xf32>
    %c0_20 = arith.constant 0 : index
    %c1_21 = arith.constant 1 : index
    %c0_22 = arith.constant 0 : index
    %c0_23 = arith.constant 0 : index
    %22 = vector.load %arg7[%c0_20, %c1_21, %c0_22, %c0_23] : memref<2x9x9x256xf32, #tpu.memory_space<vmem>>, vector<2x8x8x256xf32>
    %23 = vector.extract_strided_slice %22 {offsets = [0, 0, 0, 128], sizes = [2, 8, 8, 64], strides = [1, 1, 1, 1]} : vector<2x8x8x256xf32> to vector<2x8x8x64xf32>
    %24 = vector.extract_strided_slice %22 {offsets = [0, 0, 0, 192], sizes = [2, 8, 8, 64], strides = [1, 1, 1, 1]} : vector<2x8x8x256xf32> to vector<2x8x8x64xf32>
    %25 = arith.maximumf %23, %24 : vector<2x8x8x64xf32>
    %26 = arith.maximumf %21, %25 : vector<2x8x8x64xf32>
    %c0_24 = arith.constant 0 : index
    %c0_25 = arith.constant 0 : index
    %c1_26 = arith.constant 1 : index
    %c0_27 = arith.constant 0 : index
    %27 = vector.load %arg7[%c0_24, %c0_25, %c1_26, %c0_27] : memref<2x9x9x256xf32, #tpu.memory_space<vmem>>, vector<2x8x8x256xf32>
    %28 = vector.extract_strided_slice %27 {offsets = [0, 0, 0, 64], sizes = [2, 8, 8, 64], strides = [1, 1, 1, 1]} : vector<2x8x8x256xf32> to vector<2x8x8x64xf32>
    %29 = vector.extract_strided_slice %27 {offsets = [0, 0, 0, 192], sizes = [2, 8, 8, 64], strides = [1, 1, 1, 1]} : vector<2x8x8x256xf32> to vector<2x8x8x64xf32>
    %30 = arith.maximumf %28, %29 : vector<2x8x8x64xf32>
    %31 = arith.maximumf %26, %30 : vector<2x8x8x64xf32>
    %c0_28 = arith.constant 0 : index
    %c0_29 = arith.constant 0 : index
    %c0_30 = arith.constant 0 : index
    %c0_31 = arith.constant 0 : index
    %32 = vector.load %arg7[%c0_28, %c0_29, %c0_30, %c0_31] : memref<2x9x9x256xf32, #tpu.memory_space<vmem>>, vector<2x8x8x256xf32>
    %33 = vector.extract_strided_slice %32 {offsets = [0, 0, 0, 192], sizes = [2, 8, 8, 64], strides = [1, 1, 1, 1]} : vector<2x8x8x256xf32> to vector<2x8x8x64xf32>
    %34 = arith.maximumf %31, %33 : vector<2x8x8x64xf32>
    %35 = vector.extract_strided_slice %34 {offsets = [0, 0, 0, 0], sizes = [2, 7, 7, 64], strides = [1, 1, 1, 1]} : vector<2x8x8x64xf32> to vector<2x7x7x64xf32>
    %cst_32 = arith.constant dense<0.000000e+00> : vector<2x64xf32>
    %36 = vector.multi_reduction <add>, %35, %cst_32 [1, 2] : vector<2x7x7x64xf32> to vector<2x64xf32>
    %c0_33 = arith.constant 0 : index
    %c0_34 = arith.constant 0 : index
    %c0_35 = arith.constant 0 : index
    %37 = vector.load %arg4[%c0_33, %c0_34, %c0_35] : memref<9x64x64xf32, #tpu.memory_space<vmem>>, vector<1x64x64xf32>
    %38 = vector.shape_cast %37 : vector<1x64x64xf32> to vector<64x64xf32>
    %cst_36 = arith.constant dense<0.000000e+00> : vector<2x64xf32>
    %39 = tpu.matmul %36, %38, %cst_36 {dimension_numbers = #tpu.dot_dimension_numbers<[1], [0], [0], [1], [0, 0, 1, 1], [], []>} : vector<2x64xf32>, vector<64x64xf32>, vector<2x64xf32> -> vector<2x64xf32>
    %40 = vector.extract_strided_slice %34 {offsets = [0, 0, 0, 0], sizes = [2, 7, 8, 64], strides = [1, 1, 1, 1]} : vector<2x8x8x64xf32> to vector<2x7x8x64xf32>
    %cst_37 = arith.constant dense<0.000000e+00> : vector<2x64xf32>
    %41 = vector.multi_reduction <add>, %40, %cst_37 [1, 2] : vector<2x7x8x64xf32> to vector<2x64xf32>
    %c1_38 = arith.constant 1 : index
    %c0_39 = arith.constant 0 : index
    %c0_40 = arith.constant 0 : index
    %42 = vector.load %arg4[%c1_38, %c0_39, %c0_40] : memref<9x64x64xf32, #tpu.memory_space<vmem>>, vector<1x64x64xf32>
    %43 = vector.shape_cast %42 : vector<1x64x64xf32> to vector<64x64xf32>
    %cst_41 = arith.constant dense<0.000000e+00> : vector<2x64xf32>
    %44 = tpu.matmul %41, %43, %cst_41 {dimension_numbers = #tpu.dot_dimension_numbers<[1], [0], [0], [1], [0, 0, 1, 1], [], []>} : vector<2x64xf32>, vector<64x64xf32>, vector<2x64xf32> -> vector<2x64xf32>
    %45 = arith.addf %39, %44 : vector<2x64xf32>
    %46 = vector.extract_strided_slice %34 {offsets = [0, 0, 1, 0], sizes = [2, 7, 7, 64], strides = [1, 1, 1, 1]} : vector<2x8x8x64xf32> to vector<2x7x7x64xf32>
    %cst_42 = arith.constant dense<0.000000e+00> : vector<2x64xf32>
    %47 = vector.multi_reduction <add>, %46, %cst_42 [1, 2] : vector<2x7x7x64xf32> to vector<2x64xf32>
    %c2 = arith.constant 2 : index
    %c0_43 = arith.constant 0 : index
    %c0_44 = arith.constant 0 : index
    %48 = vector.load %arg4[%c2, %c0_43, %c0_44] : memref<9x64x64xf32, #tpu.memory_space<vmem>>, vector<1x64x64xf32>
    %49 = vector.shape_cast %48 : vector<1x64x64xf32> to vector<64x64xf32>
    %cst_45 = arith.constant dense<0.000000e+00> : vector<2x64xf32>
    %50 = tpu.matmul %47, %49, %cst_45 {dimension_numbers = #tpu.dot_dimension_numbers<[1], [0], [0], [1], [0, 0, 1, 1], [], []>} : vector<2x64xf32>, vector<64x64xf32>, vector<2x64xf32> -> vector<2x64xf32>
    %51 = arith.addf %45, %50 : vector<2x64xf32>
    %52 = vector.extract_strided_slice %34 {offsets = [0, 0, 0, 0], sizes = [2, 8, 7, 64], strides = [1, 1, 1, 1]} : vector<2x8x8x64xf32> to vector<2x8x7x64xf32>
    %cst_46 = arith.constant dense<0.000000e+00> : vector<2x64xf32>
    %53 = vector.multi_reduction <add>, %52, %cst_46 [1, 2] : vector<2x8x7x64xf32> to vector<2x64xf32>
    %c3 = arith.constant 3 : index
    %c0_47 = arith.constant 0 : index
    %c0_48 = arith.constant 0 : index
    %54 = vector.load %arg4[%c3, %c0_47, %c0_48] : memref<9x64x64xf32, #tpu.memory_space<vmem>>, vector<1x64x64xf32>
    %55 = vector.shape_cast %54 : vector<1x64x64xf32> to vector<64x64xf32>
    %cst_49 = arith.constant dense<0.000000e+00> : vector<2x64xf32>
    %56 = tpu.matmul %53, %55, %cst_49 {dimension_numbers = #tpu.dot_dimension_numbers<[1], [0], [0], [1], [0, 0, 1, 1], [], []>} : vector<2x64xf32>, vector<64x64xf32>, vector<2x64xf32> -> vector<2x64xf32>
    %57 = arith.addf %51, %56 : vector<2x64xf32>
    %cst_50 = arith.constant dense<0.000000e+00> : vector<2x64xf32>
    %58 = vector.multi_reduction <add>, %34, %cst_50 [1, 2] : vector<2x8x8x64xf32> to vector<2x64xf32>
    %c4 = arith.constant 4 : index
    %c0_51 = arith.constant 0 : index
    %c0_52 = arith.constant 0 : index
    %59 = vector.load %arg4[%c4, %c0_51, %c0_52] : memref<9x64x64xf32, #tpu.memory_space<vmem>>, vector<1x64x64xf32>
    %60 = vector.shape_cast %59 : vector<1x64x64xf32> to vector<64x64xf32>
    %cst_53 = arith.constant dense<0.000000e+00> : vector<2x64xf32>
    %61 = tpu.matmul %58, %60, %cst_53 {dimension_numbers = #tpu.dot_dimension_numbers<[1], [0], [0], [1], [0, 0, 1, 1], [], []>} : vector<2x64xf32>, vector<64x64xf32>, vector<2x64xf32> -> vector<2x64xf32>
    %62 = arith.addf %57, %61 : vector<2x64xf32>
    %63 = vector.extract_strided_slice %34 {offsets = [0, 0, 1, 0], sizes = [2, 8, 7, 64], strides = [1, 1, 1, 1]} : vector<2x8x8x64xf32> to vector<2x8x7x64xf32>
    %cst_54 = arith.constant dense<0.000000e+00> : vector<2x64xf32>
    %64 = vector.multi_reduction <add>, %63, %cst_54 [1, 2] : vector<2x8x7x64xf32> to vector<2x64xf32>
    %c5 = arith.constant 5 : index
    %c0_55 = arith.constant 0 : index
    %c0_56 = arith.constant 0 : index
    %65 = vector.load %arg4[%c5, %c0_55, %c0_56] : memref<9x64x64xf32, #tpu.memory_space<vmem>>, vector<1x64x64xf32>
    %66 = vector.shape_cast %65 : vector<1x64x64xf32> to vector<64x64xf32>
    %cst_57 = arith.constant dense<0.000000e+00> : vector<2x64xf32>
    %67 = tpu.matmul %64, %66, %cst_57 {dimension_numbers = #tpu.dot_dimension_numbers<[1], [0], [0], [1], [0, 0, 1, 1], [], []>} : vector<2x64xf32>, vector<64x64xf32>, vector<2x64xf32> -> vector<2x64xf32>
    %68 = arith.addf %62, %67 : vector<2x64xf32>
    %69 = vector.extract_strided_slice %34 {offsets = [0, 1, 0, 0], sizes = [2, 7, 7, 64], strides = [1, 1, 1, 1]} : vector<2x8x8x64xf32> to vector<2x7x7x64xf32>
    %cst_58 = arith.constant dense<0.000000e+00> : vector<2x64xf32>
    %70 = vector.multi_reduction <add>, %69, %cst_58 [1, 2] : vector<2x7x7x64xf32> to vector<2x64xf32>
    %c6 = arith.constant 6 : index
    %c0_59 = arith.constant 0 : index
    %c0_60 = arith.constant 0 : index
    %71 = vector.load %arg4[%c6, %c0_59, %c0_60] : memref<9x64x64xf32, #tpu.memory_space<vmem>>, vector<1x64x64xf32>
    %72 = vector.shape_cast %71 : vector<1x64x64xf32> to vector<64x64xf32>
    %cst_61 = arith.constant dense<0.000000e+00> : vector<2x64xf32>
    %73 = tpu.matmul %70, %72, %cst_61 {dimension_numbers = #tpu.dot_dimension_numbers<[1], [0], [0], [1], [0, 0, 1, 1], [], []>} : vector<2x64xf32>, vector<64x64xf32>, vector<2x64xf32> -> vector<2x64xf32>
    %74 = arith.addf %68, %73 : vector<2x64xf32>
    %75 = vector.extract_strided_slice %34 {offsets = [0, 1, 0, 0], sizes = [2, 7, 8, 64], strides = [1, 1, 1, 1]} : vector<2x8x8x64xf32> to vector<2x7x8x64xf32>
    %cst_62 = arith.constant dense<0.000000e+00> : vector<2x64xf32>
    %76 = vector.multi_reduction <add>, %75, %cst_62 [1, 2] : vector<2x7x8x64xf32> to vector<2x64xf32>
    %c7 = arith.constant 7 : index
    %c0_63 = arith.constant 0 : index
    %c0_64 = arith.constant 0 : index
    %77 = vector.load %arg4[%c7, %c0_63, %c0_64] : memref<9x64x64xf32, #tpu.memory_space<vmem>>, vector<1x64x64xf32>
    %78 = vector.shape_cast %77 : vector<1x64x64xf32> to vector<64x64xf32>
    %cst_65 = arith.constant dense<0.000000e+00> : vector<2x64xf32>
    %79 = tpu.matmul %76, %78, %cst_65 {dimension_numbers = #tpu.dot_dimension_numbers<[1], [0], [0], [1], [0, 0, 1, 1], [], []>} : vector<2x64xf32>, vector<64x64xf32>, vector<2x64xf32> -> vector<2x64xf32>
    %80 = arith.addf %74, %79 : vector<2x64xf32>
    %81 = vector.extract_strided_slice %34 {offsets = [0, 1, 1, 0], sizes = [2, 7, 7, 64], strides = [1, 1, 1, 1]} : vector<2x8x8x64xf32> to vector<2x7x7x64xf32>
    %cst_66 = arith.constant dense<0.000000e+00> : vector<2x64xf32>
    %82 = vector.multi_reduction <add>, %81, %cst_66 [1, 2] : vector<2x7x7x64xf32> to vector<2x64xf32>
    %c8 = arith.constant 8 : index
    %c0_67 = arith.constant 0 : index
    %c0_68 = arith.constant 0 : index
    %83 = vector.load %arg4[%c8, %c0_67, %c0_68] : memref<9x64x64xf32, #tpu.memory_space<vmem>>, vector<1x64x64xf32>
    %84 = vector.shape_cast %83 : vector<1x64x64xf32> to vector<64x64xf32>
    %cst_69 = arith.constant dense<0.000000e+00> : vector<2x64xf32>
    %85 = tpu.matmul %82, %84, %cst_69 {dimension_numbers = #tpu.dot_dimension_numbers<[1], [0], [0], [1], [0, 0, 1, 1], [], []>} : vector<2x64xf32>, vector<64x64xf32>, vector<2x64xf32> -> vector<2x64xf32>
    %86 = arith.addf %80, %85 : vector<2x64xf32>
    %cst_70 = arith.constant 1.562500e-02 : f32
    %87 = vector.broadcast %cst_70 : f32 to vector<2x64xf32>
    %88 = arith.mulf %86, %87 : vector<2x64xf32>
    %c0_71 = arith.constant 0 : index
    %c0_72 = arith.constant 0 : index
    %89 = vector.load %arg5[%c0_71, %c0_72] : memref<1x64xf32, #tpu.memory_space<vmem>>, vector<1x64xf32>
    %90 = vector.broadcast %89 : vector<1x64xf32> to vector<2x64xf32>
    %91 = arith.addf %88, %90 : vector<2x64xf32>
    %92 = vector.shape_cast %91 : vector<2x64xf32> to vector<2x1x64xf32>
    %c0_73 = arith.constant 0 : index
    %c0_74 = arith.constant 0 : index
    %c0_75 = arith.constant 0 : index
    %93 = vector.load %arg6[%c0_73, %c0_74, %c0_75] : memref<2x1x64xf32, #tpu.memory_space<vmem>>, vector<2x1x64xf32>
    tpu.vector_store %arg6[%c0_73, %c0_74, %c0_75], %92 {strides = array<i32>} : memref<2x1x64xf32, #tpu.memory_space<vmem>>, vector<2x1x64xf32>,
    return
  }
  func.func @transform_0(%arg0: i32) -> (i32, i32, i32) {
    %c0_i32 = arith.constant 0 : i32
    %c0_i32_0 = arith.constant 0 : i32
    %c0_i32_1 = arith.constant 0 : i32
    return %arg0, %c0_i32, %c0_i32_0 : i32, i32, i32
  }
  func.func @transform_1(%arg0: i32) -> (i32, i32) {
    %c0_i32 = arith.constant 0 : i32
    %c0_i32_0 = arith.constant 0 : i32
    %c0_i32_1 = arith.constant 0 : i32
    return %c0_i32, %c0_i32_0 : i32, i32
  }
  func.func @transform_2(%arg0: i32) -> (i32, i32) {
    %c0_i32 = arith.constant 0 : i32
    %c0_i32_0 = arith.constant 0 : i32
    %c0_i32_1 = arith.constant 0 : i32
    return %c0_i32, %c0_i32_0 : i32, i32
  }
  func.func @transform_3(%arg0: i32) -> (i32, i32, i32) {
    %c0_i32 = arith.constant 0 : i32
    %c0_i32_0 = arith.constant 0 : i32
    %c0_i32_1 = arith.constant 0 : i32
    %c0_i32_2 = arith.constant 0 : i32
    return %c0_i32, %c0_i32_0, %c0_i32_1 : i32, i32, i32
  }
  func.func @transform_4(%arg0: i32) -> (i32, i32) {
    %c0_i32 = arith.constant 0 : i32
    %c0_i32_0 = arith.constant 0 : i32
    %c0_i32_1 = arith.constant 0 : i32
    return %c0_i32, %c0_i32_0 : i32, i32
  }
  func.func @transform_5(%arg0: i32) -> (i32, i32, i32) {
    %c0_i32 = arith.constant 0 : i32
    %c0_i32_0 = arith.constant 0 : i32
    %c0_i32_1 = arith.constant 0 : i32
    return %arg0, %c0_i32, %c0_i32_0 : i32, i32, i32
  }
}

</mosaic_0001>

<bundles_post_ra>
// kernel: block_forward.1
= control target key start
LH: loop header
LB: loop body
LE: loop exit
PB: predicated region body
PF: predicated region fallthrough
CT: control target
= control target key end

     0   :  { %10 = vsyncpa [#allocation4], 0  ;;  %s5107_s0 = inlined_call_operand.vmem [shape: bf16[4,64,432], index: 0, kind: input, shape index: {}]   ;;  %s5108_s1 = inlined_call_operand.vmem [shape: bf16[432,256], index: 1, kind: input, shape index: {}]   ;;  %s5109_s2 = inlined_call_operand.vmem [shape: f32[1,256], index: 2, kind: input, shape index: {}]   ;;  %s5110_s3 = inlined_call_operand.vmem [shape: f32[9,64,64], index: 3, kind: input, shape index: {}]   ;;  %s5111_s4 = inlined_call_operand.vmem [shape: f32[1,64], index: 4, kind: input, shape index: {}]   ;;  %s5112_s5 = inlined_call_operand.hbm [shape: f32[4,1,64], index: 5, kind: output, shape index: {}]  }
   0x1   :  { %12 = vsyncpa [#allocation4 + $0x1], 0  ;;  %s3725_s18 = smov 0   ;;  %s3727_s19 = smov 0  }
   0x2   :  { %s3729_s20 = smov 0   ;;  %s3731_s21 = smov 0  }
   0x3 LB: > { %s3746_s22 = sadd.s32 4294967295, %s3686_s21   ;;  %s3012_s23 = sadd.s32 4294967294, %s3686_s21   ;;  %s3686_s21 = sphi %s3731_s21, %s5169_s21   ;;  %s3682_s20 = sphi %s3729_s20, %s5168_s20   ;;  %s3678_s19 = sphi %s3727_s19, %s5167_s19   ;;  %s3674_s18 = sphi %s3725_s18, %s5166_s18  }
   0x4   : > { %s3750_s24 = sadd.s32 1, %s3686_s21   ;;  %s135_s25 = sadd.s32 1, %s3682_s20 }
   0x5   : > { %s132_s26 = ssub.s32 %s3686_s21, %s3750_s24  ;;  %p145_p0 = scmp.ne.s32.totalorder %s3682_s20, %s3678_s19 }
   0x6   : > { %p133_p1 = scmp.eq.s32.totalorder %s132_s26, 0  ;;  %p146_p2 = scmp.eq.s32.totalorder %s3746_s22, 1 }
   0x7   : > { %p151_p3 = scmp.ne.s32.totalorder %s3678_s19, %s3674_s18  ;;  %p152_p4 = scmp.eq.s32.totalorder %s3012_s23, 1 }
   0x8   : > { %s3761_s27 = scalar_select %p133_p1, %s3682_s20, %s135_s25  }
   0x9   : > { %p3763_p5 = por %p146_p2, %p145_p0  ;;  %p3767_p6 = por %p152_p4, %p151_p3 }
   0xa   : > { %p3015_p7 = scmp.ge.s32.totalorder %s3686_s21, 1  ;;  %p192_p8 = scmp.lt.s32.totalorder %s3686_s21, 3 }
   0xc   : > { %p193_p9 = pnand %p3015_p7, %p192_p8 }
   0xe   : > { %196 = sbr.rel (%p193_p9) target bundleno = 848 (0x350), region = 40 }
  0x13   : > { %v3497_v0 = vld [vmem:[%s5108_s1 + $0x74] ss:$8 sps:$4 sm:$0xff]   ;;  %v3499_v1 = vld [vmem:[%s5108_s1 + $0x70] ss:$8 sps:$4 sm:$0xff]   ;;  %v3500_v2 = vld [vmem:[%s5108_s1 + $0x64] ss:$8 sps:$4 sm:$0xff]  }
  0x14   : > { %840 = vmatprep.subr.bf16.mxu0 %v3497_v0  ;;  %v3502_v3 = vld [vmem:[%s5108_s1 + $0x60] ss:$8 sps:$4 sm:$0xff]   ;;  %v3503_v4 = vld [vmem:[%s5108_s1 + $0x54] ss:$8 sps:$4 sm:$0xff]   ;;  %v3505_v5 = vld [vmem:[%s5108_s1 + $0x50] ss:$8 sps:$4 sm:$0xff]  }
  0x15   : > { %841 = vmatpush1.bf16.msra.mxu0 %v3499_v1  ;;  %v3511_v6 = vld [vmem:[%s5108_s1 + $0x174] ss:$8 sps:$4 sm:$0xff]   ;;  %v3514_v7 = vld [vmem:[%s5108_s1 + $0x170] ss:$8 sps:$4 sm:$0xff]   ;;  %v3506_v8 = vld [vmem:[%s5108_s1 + $0x44] ss:$8 sps:$4 sm:$0xff]  }
  0x16   : > { %842 = vmatprep.subr.bf16.mxu0 %v3500_v2  ;;  %953 = vmatprep.subr.bf16.mxu1 %v3511_v6  ;;  %v3517_v9 = vld [vmem:[%s5108_s1 + $0x164] ss:$8 sps:$4 sm:$0xff]   ;;  %v3520_v10 = vld [vmem:[%s5108_s1 + $0x160] ss:$8 sps:$4 sm:$0xff]   ;;  %v3509_v12 = vld [vmem:[%s5108_s1 + $0x34] ss:$8 sps:$4 sm:$0xff]  }
  0x17   : > { %954 = vmatpush1.bf16.msra.mxu1 %v3514_v7  ;;  %v3508_v11 = vld [vmem:[%s5108_s1 + $0x40] ss:$8 sps:$4 sm:$0xff]   ;;  %v3523_v13 = vld [vmem:[%s5108_s1 + $0x154] ss:$8 sps:$4 sm:$0xff]   ;;  %v3526_v14 = vld [vmem:[%s5108_s1 + $0x150] ss:$8 sps:$4 sm:$0xff]  }
  0x18   : > { %955 = vmatprep.subr.bf16.mxu1 %v3517_v9  ;;  %v3513_v15 = vld [vmem:[%s5108_s1 + $0x30] ss:$8 sps:$4 sm:$0xff]   ;;  %v3529_v16 = vld [vmem:[%s5108_s1 + $0x144] ss:$8 sps:$4 sm:$0xff]   ;;  %v3519_v18 = vld [vmem:[%s5108_s1 + $0x20] ss:$8 sps:$4 sm:$0xff]  }
  0x19   : > { %843 = vmatpush1.bf16.msra.mxu0 %v3502_v3  ;;  %v3515_v17 = vld [vmem:[%s5108_s1 + $0x24] ss:$8 sps:$4 sm:$0xff]   ;;  %v3532_v19 = vld [vmem:[%s5108_s1 + $0x140] ss:$8 sps:$4 sm:$0xff]   ;;  %s3017_s13 = sshll.u32 %s3746_s22, 1  ;;  %vm815_vm0 = vcmask 392192  }
  0x1a   : > { %844 = vmatprep.subr.bf16.mxu0 %v3503_v4  ;;  %v3535_v20 = vld [vmem:[%s5108_s1 + $0x134] ss:$8 sps:$4 sm:$0xff]   ;;  %p222_p10 = scmp.lt.s32.totalorder %s3017_s13, 3  ;;  %v3538_v22 = vld [vmem:[%s5108_s1 + $0x130] ss:$8 sps:$4 sm:$0xff]   ;;  %vm1643_vm2 = vcmask 1046528  }
  0x1b   : > { %956 = vmatpush1.bf16.msra.mxu1 %v3520_v10  ;;  %v3521_v21 = vld [vmem:[%s5108_s1 + $0x14] ss:$8 sps:$4 sm:$0xff]   ;;  %v3525_v23 = vld [vmem:[%s5108_s1 + $0x10] ss:$8 sps:$4 sm:$0xff]   ;;  %v3541_v24 = vld [vmem:[%s5108_s1 + $0x124] ss:$8 sps:$4 sm:$0xff]  }
  0x1c   : > { %957 = vmatprep.subr.bf16.mxu1 %v3523_v13  ;;  %v3527_v25 = vld [vmem:[%s5108_s1 + $0x4] ss:$8 sps:$4 sm:$0xff]   ;;  %s5171_s13 = smov (!%p222_p10, %s3017_s13), 3  ;;  %v3531_v26 = vld [vmem:[%s5108_s1] ss:$8 sps:$4 sm:$0xff]   ;;  %vm1852_vm3 = vcmask 522240  }
  0x1d   : > { %845 = vmatpush1.bf16.msra.mxu0 %v3505_v5  ;;  %v3544_v27 = vld [vmem:[%s5108_s1 + $0x120] ss:$8 sps:$4 sm:$0xff]   ;;  %v3547_v28 = vld [vmem:[%s5108_s1 + $0x114] ss:$8 sps:$4 sm:$0xff]   ;;  %s3193_s25 = sshll.u32 %s5171_s13, 7  ;;  %vm1899_vm4 = vcmask 523264  }
  0x1e   : > { %846 = vmatprep.subr.bf16.mxu0 %v3506_v8  ;;  %v3533_v29 = vld [vmem:[%s5108_s1 + $0xf4] ss:$8 sps:$4 sm:$0xff]   ;;  %v3550_v30 = vld [vmem:[%s5108_s1 + $0x110] ss:$8 sps:$4 sm:$0xff]   ;;  %v3553_v32 = vld [vmem:[%s5108_s1 + $0x104] ss:$8 sps:$4 sm:$0xff]   ;;  %s3879_s14 = scalar_lea.vmem %s5107_s0, %s3193_s25 }
  0x1f   : > { %958 = vmatpush1.bf16.msra.mxu1 %v3526_v14  ;;  %v3537_v31 = vld [vmem:[%s5108_s1 + $0xf0] ss:$8 sps:$4 sm:$0xff]   ;;  %v3539_v33 = vld [vmem:[%s5108_s1 + $0xe4] ss:$8 sps:$4 sm:$0xff]   ;;  %v3543_v34 = vld [vmem:[%s5108_s1 + $0xe0] ss:$8 sps:$4 sm:$0xff]  }
  0x20   : > { %959 = vmatprep.subr.bf16.mxu1 %v3529_v16  ;;  %v3556_v35 = vld [vmem:[%s5108_s1 + $0x100] ss:$8 sps:$4 sm:$0xff]   ;;  %v3559_v36 = vld [vmem:[%s5108_s1 + $0x1a4] ss:$8 sps:$4 sm:$0xff]   ;;  %v3545_v38 = vld [vmem:[%s5108_s1 + $0xd4] ss:$8 sps:$4 sm:$0xff]  }
  0x21   : > { %847 = vmatpush1.bf16.msra.mxu0 %v3508_v11  ;;  %v3577_v37 = vld [vmem:[%s3879_s14 + $0xc] ss:$16 sps:$4 sm:$0xff]   ;;  %v3562_v39 = vld [vmem:[%s5108_s1 + $0x1a0] ss:$8 sps:$4 sm:$0xff]   ;;  %v3583_v40 = vld [vmem:[%s3879_s14 + $0x4] ss:$16 sps:$4 sm:$0xff]  }
  0x22   : > { %848 = vmatprep.subr.bf16.mxu0 %v3509_v12  ;;  %3106 = vmatprep.mubr.msk.bf16.mxu1 %vm815_vm0, %v3577_v37  ;;  %v3549_v41 = vld [vmem:[%s5108_s1 + $0xd0] ss:$8 sps:$4 sm:$0xff]   ;;  %v3565_v42 = vld [vmem:[%s5108_s1 + $0x194] ss:$8 sps:$4 sm:$0xff]   ;;  %v3551_v43 = vld [vmem:[%s5108_s1 + $0xc4] ss:$8 sps:$4 sm:$0xff]  }
  0x23   : > { %960 = vmatpush1.bf16.msra.mxu1 %v3532_v19  ;;  %872 = vmatprep.mubr.bf16.mxu0 %v3583_v40  ;;  %v3568_v44 = vld [vmem:[%s5108_s1 + $0x190] ss:$8 sps:$4 sm:$0xff]   ;;  %v3555_v45 = vld [vmem:[%s5108_s1 + $0xc0] ss:$8 sps:$4 sm:$0xff]   ;;  %v3571_v46 = vld [vmem:[%s5108_s1 + $0x184] ss:$8 sps:$4 sm:$0xff]  }
  0x24   : > { %961 = vmatprep.subr.bf16.mxu1 %v3535_v20  ;;  %v3557_v47 = vld [vmem:[%s5108_s1 + $0xb4] ss:$8 sps:$4 sm:$0xff]   ;;  %v3574_v48 = vld [vmem:[%s5108_s1 + $0x180] ss:$8 sps:$4 sm:$0xff]   ;;  %v3561_v49 = vld [vmem:[%s5108_s1 + $0xb0] ss:$8 sps:$4 sm:$0xff]  }
  0x25   : > { %849 = vmatpush1.bf16.msra.mxu0 %v3513_v15  ;;  %v3563_v50 = vld [vmem:[%s5108_s1 + $0xa4] ss:$8 sps:$4 sm:$0xff]   ;;  %v3575_v51 = vld [vmem:[%s3879_s14 + $0x8] ss:$16 sps:$4 sm:$0xff]   ;;  %v3569_v54 = vld [vmem:[%s5108_s1 + $0x94] ss:$8 sps:$4 sm:$0xff]  }
  0x26   : > { %850 = vmatprep.subr.bf16.mxu0 %v3515_v17  ;;  %v3587_v52 = vld [vmem:[%s3879_s14 + $0x2c] ss:$16 sps:$4 sm:$0xff]   ;;  %v3567_v53 = vld [vmem:[%s5108_s1 + $0xa0] ss:$8 sps:$4 sm:$0xff]   ;;  %v3573_v55 = vld [vmem:[%s5108_s1 + $0x90] ss:$8 sps:$4 sm:$0xff]  }
  0x27   : > { %962 = vmatpush1.bf16.msra.mxu1 %v3538_v22  ;;  %v3578_v56 = vld [vmem:[%s5108_s1 + $0x84] ss:$8 sps:$4 sm:$0xff]   ;;  %v3589_v57 = vld [vmem:[%s3879_s14 + $0x28] ss:$16 sps:$4 sm:$0xff]   ;;  %v3581_v60 = vld [vmem:[%s3879_s14] ss:$16 sps:$4 sm:$0xff]  }
  0x28   : > { %963 = vmatprep.subr.bf16.mxu1 %v3541_v24  ;;  %v3593_v58 = vld [vmem:[%s3879_s14 + $0x4c] ss:$16 sps:$4 sm:$0xff]   ;;  %v3580_v59 = vld [vmem:[%s5108_s1 + $0x80] ss:$8 sps:$4 sm:$0xff]   ;;  %v3584_v61 = vld [vmem:[%s3879_s14 + $0x24] ss:$16 sps:$4 sm:$0xff]  }
  0x29   : > { %851 = vmatpush1.bf16.msra.mxu0 %v3519_v18  ;;  %v3595_v62 = vld [vmem:[%s3879_s14 + $0x48] ss:$16 sps:$4 sm:$0xff]   ;;  %v3599_v63 = vld [vmem:[%s3879_s14 + $0x6c] ss:$16 sps:$4 sm:$0xff]   ;;  %v3586_v0 = vld [vmem:[%s3879_s14 + $0x20] ss:$16 sps:$4 sm:$0xff]  }
  0x2a   : > { %852 = vmatprep.subr.bf16.mxu0 %v3521_v21  ;;  %v3590_v1 = vld [vmem:[%s3879_s14 + $0x44] ss:$16 sps:$4 sm:$0xff]   ;;  %v3601_v2 = vld [vmem:[%s3879_s14 + $0x68] ss:$16 sps:$4 sm:$0xff]   ;;  %v3605_v3 = vld [vmem:[%s3879_s14 + $0x8c] ss:$16 sps:$4 sm:$0xff]  }
  0x2b   : > { %964 = vmatpush1.bf16.msra.mxu1 %v3544_v27  ;;  %v3592_v4 = vld [vmem:[%s3879_s14 + $0x40] ss:$16 sps:$4 sm:$0xff]   ;;  %v3596_v5 = vld [vmem:[%s3879_s14 + $0x64] ss:$16 sps:$4 sm:$0xff]   ;;  %v3607_v6 = vld [vmem:[%s3879_s14 + $0x88] ss:$16 sps:$4 sm:$0xff]  }
  0x2c   : > { %965 = vmatprep.subr.bf16.mxu1 %v3547_v28  ;;  %v3611_v7 = vld [vmem:[%s3879_s14 + $0xac] ss:$16 sps:$4 sm:$0xff]   ;;  %v3598_v8 = vld [vmem:[%s3879_s14 + $0x60] ss:$16 sps:$4 sm:$0xff]   ;;  %v3602_v9 = vld [vmem:[%s3879_s14 + $0x84] ss:$16 sps:$4 sm:$0xff]  }
  0x2d   : > { %853 = vmatpush1.bf16.msra.mxu0 %v3525_v23  ;;  %v3613_v10 = vld [vmem:[%s3879_s14 + $0xa8] ss:$16 sps:$4 sm:$0xff]   ;;  %v3617_v11 = vld [vmem:[%s3879_s14 + $0xcc] ss:$16 sps:$4 sm:$0xff]   ;;  %v3604_v12 = vld [vmem:[%s3879_s14 + $0x80] ss:$16 sps:$4 sm:$0xff]   ;;  %v238_v23 = vlaneseq }
  0x2e   : > { %854 = vmatprep.subr.bf16.mxu0 %v3527_v25  ;;  %v3608_v13 = vld [vmem:[%s3879_s14 + $0xa4] ss:$16 sps:$4 sm:$0xff]   ;;  %v3619_v14 = vld [vmem:[%s3879_s14 + $0xc8] ss:$16 sps:$4 sm:$0xff]   ;;  %v3623_v15 = vld [vmem:[%s3879_s14 + $0xec] ss:$16 sps:$4 sm:$0xff]  }
  0x2f   : > { %966 = vmatpush1.bf16.msra.mxu1 %v3550_v30  ;;  %v3610_v16 = vld [vmem:[%s3879_s14 + $0xa0] ss:$16 sps:$4 sm:$0xff]   ;;  %v3614_v17 = vld [vmem:[%s3879_s14 + $0xc4] ss:$16 sps:$4 sm:$0xff]   ;;  %v3625_v18 = vld [vmem:[%s3879_s14 + $0xe8] ss:$16 sps:$4 sm:$0xff]  }
  0x30   : > { %967 = vmatprep.subr.bf16.mxu1 %v3553_v32  ;;  %v3616_v19 = vld [vmem:[%s3879_s14 + $0xc0] ss:$16 sps:$4 sm:$0xff]   ;;  %v3620_v20 = vld [vmem:[%s3879_s14 + $0xe4] ss:$16 sps:$4 sm:$0xff]   ;;  %v5113_v22 = vmov 0.0   ;;  %vm3991_vm1 = vcmp.lt.s32.totalorder %v238_v23, 256 }
  0x31   : > { %855 = vmatpush1.bf16.msra.mxu0 %v3531_v26  ;;  %v3622_v21 = vld [vmem:[%s3879_s14 + $0xe0] ss:$16 sps:$4 sm:$0xff]   ;;  %230 = vst [vmem:[#allocation2] sm:$0xff] %v5113_v22  ;;  %231 = vst [vmem:[#allocation2 + $0x8] sm:$0xff] %v5113_v22  ;;  %s3689_s14 = smov 64   ;;  %vm3690_vm5 = vmmov 0  }
  0x32   : > { %856 = vmatprep.subr.bf16.mxu0 %v3533_v29  ;;  %232 = vst [vmem:[#allocation2 + $0x10] sm:$0x1] %v5113_v22  ;;  %233 = vst [vmem:[#allocation2 + $0x18] sm:$0x1] %v5113_v22  ;;  %vm1949_vm6 = vcmask 1041409   ;;  %s3194_s17 = sshll.u32 %s3746_s22, 5 }
  0x33   : > { %968 = vmatpush1.bf16.msra.mxu1 %v3556_v35  ;;  %234 = vst [vmem:[#allocation2 + $0x120] sm:$0xff] %v5113_v22  ;;  %235 = vst [vmem:[#allocation2 + $0x128] sm:$0xff] %v5113_v22  ;;  %vm2933_vm7 = vcmask 516096   ;;  %s5063_s6 = scalar_lea.hbm %s5112_s5, %s3194_s17  ;;  %s3692_s8 = smov [#allocation3]  }
  0x34   : > { %979 = vmatprep.subr.bf16.mxu1 %v3559_v36  ;;  %236 = vst [vmem:[#allocation2 + $0x130] sm:$0x1] %v5113_v22  ;;  %237 = vst [vmem:[#allocation2 + $0x138] sm:$0x1] %v5113_v22  ;;  %s3630_s9 = sshll.u32 %s3692_s8, 4  ;;  %s3631_s9 = int_to_ptr.vmem [resolvable:$false] %s3630_s9 }
  0x35   : > { %857 = vmatpush2.bf16.msra.mxu0 %v3537_v31  ;;  %242 = vst.msk [vmem:[#allocation2] ss:$8 sm:$0x3] %vm3991_vm1, %v5113_v22  ;;  %245 = vst.msk [vmem:[#allocation2 + $0x20] ss:$8 sm:$0x3] %vm3991_vm1, %v5113_v22 }
  0x36   : > { %858 = vmatprep.subr.bf16.mxu0 %v3539_v33  ;;  %248 = vst.msk [vmem:[#allocation2 + $0x40] ss:$8 sm:$0x3] %vm3991_vm1, %v5113_v22  ;;  %251 = vst.msk [vmem:[#allocation2 + $0x60] ss:$8 sm:$0x3] %vm3991_vm1, %v5113_v22 }
  0x37   : > { %980 = vmatpush2.bf16.msra.mxu1 %v3562_v39  ;;  %254 = vst.msk [vmem:[#allocation2 + $0x80] ss:$8 sm:$0x3] %vm3991_vm1, %v5113_v22  ;;  %257 = vst.msk [vmem:[#allocation2 + $0xa0] ss:$8 sm:$0x3] %vm3991_vm1, %v5113_v22 }
  0x38   : > { %981 = vmatprep.subr.bf16.mxu1 %v3565_v42  ;;  %v1515_v24 = vld [vmem:[#allocation2] sm:$0xfe]  ;;  %v1516_v25 = vld [vmem:[#allocation2 + $0x8] sm:$0xfe]  ;;  %s3632_s10 = scalar_lea.vmem %s3631_s9, 64 }
  0x39   : > { %859 = vmatpush2.bf16.msra.mxu0 %v3543_v34  ;;  %v1517_v26 = vld [vmem:[#allocation2 + $0x10] sm:$0x1]  ;;  %v1518_v27 = vld [vmem:[#allocation2 + $0x18] sm:$0x1]  ;;  %v1579_v30 = vmax.f32 %v1515_v24, %v1516_v25 }
  0x3a   : > { %860 = vmatprep.subr.bf16.mxu0 %v3545_v38  ;;  %v1547_v28 = vld [vmem:[#allocation2 + $0x120] sm:$0xfe]  ;;  %v1548_v29 = vld [vmem:[#allocation2 + $0x128] sm:$0xfe]  ;;  %v1580_v33 = vmax.f32 %v1517_v26, %v1518_v27 }
  0x3b   : > { %982 = vmatpush2.bf16.msra.mxu1 %v3568_v44  ;;  %v1549_v31 = vld [vmem:[#allocation2 + $0x130] sm:$0x1]  ;;  %v1550_v32 = vld [vmem:[#allocation2 + $0x138] sm:$0x1]  ;;  %v1595_v34 = vmax.f32 %v1547_v28, %v1548_v29  ;;  %v1644_v37 = vrot.slane %v1579_v30, 1 }
  0x3c   : > { %983 = vmatprep.subr.bf16.mxu1 %v3571_v46  ;;  %v1596_v36 = vmax.f32 %v1549_v31, %v1550_v32  ;;  %260 = vst.msk [vmem:[#allocation2 + $0xc0] ss:$8 sm:$0x3] %vm3991_vm1, %v5113_v22  ;;  %263 = vst.msk [vmem:[#allocation2 + $0xe0] ss:$8 sm:$0x3] %vm3991_vm1, %v5113_v22 }
  0x3d   : > { %861 = vmatpush2.bf16.msra.mxu0 %v3549_v41  ;;  %266 = vst.msk [vmem:[#allocation2 + $0x100] ss:$8 sm:$0x3] %vm3991_vm1, %v5113_v22  ;;  %269 = vst.msk [vmem:[#allocation2 + $0x120] ss:$8 sm:$0x3] %vm3991_vm1, %v5113_v22 }
  0x3e   : > { %862 = vmatprep.subr.bf16.mxu0 %v3551_v43  ;;  %272 = vst.msk [vmem:[#allocation2 + $0x140] ss:$8 sm:$0x3] %vm3991_vm1, %v5113_v22  ;;  %275 = vst.msk [vmem:[#allocation2 + $0x160] ss:$8 sm:$0x3] %vm3991_vm1, %v5113_v22 }
  0x3f   : > { %984 = vmatpush2.bf16.msra.mxu1 %v3574_v48  ;;  %278 = vst.msk [vmem:[#allocation2 + $0x180] ss:$8 sm:$0x3] %vm3991_vm1, %v5113_v22  ;;  %281 = vst.msk [vmem:[#allocation2 + $0x1a0] ss:$8 sm:$0x3] %vm3991_vm1, %v5113_v22 }
  0x40   : > { %3276 = vmatprep.subr.mxu1 %v5113_v22  ;;  %284 = vst.msk [vmem:[#allocation2 + $0x1c0] ss:$8 sm:$0x3] %vm3991_vm1, %v5113_v22  ;;  %287 = vst.msk [vmem:[#allocation2 + $0x1e0] ss:$8 sm:$0x3] %vm3991_vm1, %v5113_v22 }
  0x41   : > { %863 = vmatpush2.bf16.msra.mxu0 %v3555_v45  ;;  %290 = vst.msk [vmem:[#allocation2 + $0x200] ss:$8 sm:$0x3] %vm3991_vm1, %v5113_v22  ;;  %293 = vst.msk [vmem:[#allocation2 + $0x220] ss:$8 sm:$0x3] %vm3991_vm1, %v5113_v22 }
  0x42   : > { %864 = vmatprep.subr.bf16.mxu0 %v3557_v47  ;;  %986 = vmatmul.mubr.bf16.vlgmr.msra.gmra.mxu1 %v3575_v51  ;;  %v1645_v38 = vrot.slane %v1580_v33, 1  ;;  %v1668_v39 = vrot.slane %v1595_v34, 1  ;;  %v1669_v40 = vrot.slane %v1596_v36, 1  ;;  %v1756_v44 = vld [vmem:[#allocation2 + $0x8] sm:$0xff]  ;;  %v4054_v48 = vshrl.u32 %v238_v23, 7 }
  0x43   : > { %3107 = vmatprep.mubr.msk.bf16.mxu1 %vm815_vm0, %v3587_v52  ;;  %1788 = vrot.lane.b32.xlu1 %v1756_v44, %s3689_s14  ;;  %v381_v52 = vld [vmem:[%s5109_s2] sm:$0x3] }
  0x44   : > { %v1646_v41 = vsel %vm1643_vm2, %v1644_v37, %v1645_v38  ;;  %v1670_v42 = vsel %vm1643_vm2, %v1668_v39, %v1669_v40  ;;  %v1764_v45 = vld [vmem:[#allocation2 + $0x128] sm:$0xff]  ;;  %5132 = vst [vmem:[#allocation6_spill] sm:$0xff] %v4054_v48 }
  0x45   : > { %865 = vmatpush2.bf16.msra.mxu0 %v3561_v49  ;;  %v3492_v43 = vpack.i.bf16 %v1670_v42, %v1646_v41 }
  0x46   : > { %866 = vmatprep.subr.bf16.mxu0 %v3563_v50  ;;  %v385_v50 = vsub.s32 0, %v4054_v48 }
  0x47   : > { %3493 = vrot.lane.b32.xlu0 %v3492_v43, %s3689_s14  ;;  %1804 = vrot.lane.b32.xlu1 %v1764_v45, %s3689_s14 }
  0x49   : > { %867 = vmatpush2.bf16.msra.mxu0 %v3567_v53  ;;  %v389_v53 = vsub.s32 1, %v4054_v48 }
  0x4a   : > { %868 = vmatprep.subr.bf16.mxu0 %v3569_v54  ;;  %996 = vmatmul.mubr.bf16.gmra.mxu1 %v3589_v57 }
  0x4b   : > { %3108 = vmatprep.mubr.msk.bf16.mxu1 %vm815_vm0, %v3593_v58  ;;  %v4063_v57 = vrot.slane %v381_v52, %v389_v53 }
  0x4d   : > { %869 = vmatpush2.bf16.msra.mxu0 %v3573_v55  ;;  %v4061_v55 = vrot.slane %v381_v52, %v385_v50 }
  0x4e   : > { %870 = vmatprep.subr.bf16.mxu0 %v3578_v56 }
  0x51   : > { %871 = vmatpush2.bf16.msra.mxu0 %v3580_v59 }
  0x52   : > { %1006 = vmatmul.mubr.bf16.gmra.mxu1 %v3595_v62  ;;  %3314 = vmatprep.subr.mxu0 %v5113_v22 }
  0x53   : > { %3109 = vmatprep.mubr.msk.bf16.mxu1 %vm815_vm0, %v3599_v63 }
  0x54   : > { %873 = vmatmul.mubr.bf16.vlgmr.msra.gmra.mxu0 %v3581_v60 }
  0x55   : > { %882 = vmatprep.mubr.bf16.mxu0 %v3584_v61 }
  0x5a   : > { %1016 = vmatmul.mubr.bf16.gmra.mxu1 %v3601_v2 }
  0x5b   : > { %3110 = vmatprep.mubr.msk.bf16.mxu1 %vm815_vm0, %v3605_v3 }
  0x5c   : > { %883 = vmatmul.mubr.bf16.gmra.mxu0 %v3586_v0 }
  0x5d   : > { %892 = vmatprep.mubr.bf16.mxu0 %v3590_v1 }
  0x62   : > { %1026 = vmatmul.mubr.bf16.gmra.mxu1 %v3607_v6 }
  0x63   : > { %3111 = vmatprep.mubr.msk.bf16.mxu1 %vm815_vm0, %v3611_v7 }
  0x64   : > { %893 = vmatmul.mubr.bf16.gmra.mxu0 %v3592_v4 }
  0x65   : > { %902 = vmatprep.mubr.bf16.mxu0 %v3596_v5 }
  0x6a   : > { %1036 = vmatmul.mubr.bf16.gmra.mxu1 %v3613_v10 }
  0x6b   : > { %3112 = vmatprep.mubr.msk.bf16.mxu1 %vm815_vm0, %v3617_v11 }
  0x6c   : > { %903 = vmatmul.mubr.bf16.gmra.mxu0 %v3598_v8 }
  0x6d   : > { %912 = vmatprep.mubr.bf16.mxu0 %v3602_v9 }
  0x72   : > { %1046 = vmatmul.mubr.bf16.gmra.mxu1 %v3619_v14 }
  0x73   : > { %3113 = vmatprep.mubr.msk.bf16.mxu1 %vm815_vm0, %v3623_v15 }
  0x74   : > { %913 = vmatmul.mubr.bf16.gmra.mxu0 %v3604_v12 }
  0x75   : > { %922 = vmatprep.mubr.bf16.mxu0 %v3608_v13 }
  0x7a   : > { %1056 = vmatmul.mubr.bf16.gmra.mxu1 %v3625_v18 }
  0x7c   : > { %923 = vmatmul.mubr.bf16.gmra.mxu0 %v3610_v16 }
  0x7d   : > { %932 = vmatprep.mubr.bf16.mxu0 %v3614_v17 }
  0x84   : > { %933 = vmatmul.mubr.bf16.gmra.mxu0 %v3616_v19 }
  0x85   : > { %942 = vmatprep.mubr.bf16.mxu0 %v3620_v20 }
  0x8c   : > { %943 = vmatmul.mubr.bf16.gmra.mxu0 %v3622_v21 }
 0x102   : > { %v987_v46 = vpop.f32.mrf.mxu1 }
 0x104   : > { %v989_v47 = vpop.f32.mrf.mxu1 }
 0x106   : > { %v991_v49 = vpop.f32.mrf.mxu1 }
 0x108   : > { %v993_v51 = vpop.f32.mrf.mxu1 }
 0x10a   : > { %v997_v54 = vpop.f32.mrf.mxu1 }
 0x10c   : > { %v999_v56 = vpop.f32.mrf.mxu1 }
 0x10e   : > { %v1001_v58 = vpop.f32.mrf.mxu1 }
 0x110   : > { %v1003_v61 = vpop.f32.mrf.mxu1 }
 0x112   : > { %v4067_v1 = vpop.f32.mrf.mxu1 }
 0x114   : > { %v874_v59 = vpop.f32.mrf.mxu0  ;;  %v4072_v6 = vpop.f32.mrf.mxu1 }
 0x115   : > { %v875_v60 = vadd.f32 %v874_v59, %v4061_v55 }
 0x116   : > { %v876_v62 = vpop.f32.mrf.mxu0  ;;  %v4080_v12 = vpop.f32.mrf.mxu1 }
 0x117   : > { %v988_v63 = vadd.f32 %v987_v46, %v875_v60  ;;  %v877_v0 = vadd.f32 %v876_v62, %v4063_v57 }
 0x118   : > { %v878_v2 = vpop.f32.mrf.mxu0  ;;  %v4086_v18 = vpop.f32.mrf.mxu1 }
 0x119   : > { %v4069_v3 = vmax.f32 %v988_v63, 0.0  ;;  %v990_v4 = vadd.f32 %v989_v47, %v877_v0  ;;  %v879_v5 = vadd.f32 %v878_v2, %v4061_v55 }
 0x11a   : > { %v880_v7 = vpop.f32.mrf.mxu0  ;;  %v4094_v25 = vpop.f32.mrf.mxu1 }
 0x11b   : > { %v1130_v8 = vrot.slane %v4069_v3, 7  ;;  %v4075_v9 = vmax.f32 %v990_v4, 0.0  ;;  %v992_v10 = vadd.f32 %v991_v49, %v879_v5  ;;  %v881_v11 = vadd.f32 %v880_v7, %v4063_v57  ;;  %1259 = vrot.lane.b32.xlu0 %v4069_v3, %s3689_s14 }
 0x11c   : > { %v884_v13 = vpop.f32.mrf.mxu0  ;;  %v4102_v31 = vpop.f32.mrf.mxu1 }
 0x11d   : > { %1195 = vst [vmem:[#allocation2 + $0x20] sm:$0xfe] %v1130_v8  ;;  %1197 = vst [vmem:[#allocation2 + $0x30] sm:$0x1] %v1130_v8  ;;  %v1131_v14 = vrot.slane %v4075_v9, 7  ;;  %v4083_v15 = vmax.f32 %v992_v10, 0.0  ;;  %v994_v16 = vadd.f32 %v993_v51, %v881_v11  ;;  %v885_v17 = vadd.f32 %v884_v13, %v4061_v55 }
 0x11e   : > { %v886_v19 = vpop.f32.mrf.mxu0  ;;  %v4110_v37 = vpop.f32.mrf.mxu1 }
 0x11f   : > { %1196 = vst [vmem:[#allocation2 + $0x28] sm:$0xfe] %v1131_v14  ;;  %1198 = vst [vmem:[#allocation2 + $0x38] sm:$0x1] %v1131_v14  ;;  %v1132_v20 = vrot.slane %v4083_v15, 7  ;;  %v4089_v21 = vmax.f32 %v994_v16, 0.0  ;;  %1323 = vrot.lane.b32.xlu0 %v4075_v9, %s3689_s14  ;;  %v887_v23 = vadd.f32 %v886_v19, %v4063_v57  ;;  %v998_v24 = vadd.f32 %v997_v54, %v885_v17 }
 0x120   : > { %v888_v26 = vpop.f32.mrf.mxu0  ;;  %v4116_v43 = vpop.f32.mrf.mxu1 }
 0x121   : > { %1199 = vst [vmem:[#allocation2 + $0x40] sm:$0xfe] %v1132_v20  ;;  %1201 = vst [vmem:[#allocation2 + $0x50] sm:$0x1] %v1132_v20  ;;  %v1133_v27 = vrot.slane %v4089_v21, 7  ;;  %v4097_v28 = vmax.f32 %v998_v24, 0.0  ;;  %1325 = vrot.lane.b32.xlu1 %v4089_v21, %s3689_s14  ;;  %v889_v29 = vadd.f32 %v888_v26, %v4061_v55  ;;  %v1000_v30 = vadd.f32 %v999_v56, %v887_v23 }
 0x122   : > { %v890_v32 = vpop.f32.mrf.mxu0  ;;  %v4125_v52 = vpop.f32.mrf.mxu1 }
 0x123   : > { %1200 = vst [vmem:[#allocation2 + $0x48] sm:$0xfe] %v1133_v27  ;;  %1202 = vst [vmem:[#allocation2 + $0x58] sm:$0x1] %v1133_v27  ;;  %v1134_v33 = vrot.slane %v4097_v28, 7  ;;  %v4105_v34 = vmax.f32 %v1000_v30, 0.0  ;;  %1261 = vrot.lane.b32.xlu0 %v4083_v15, %s3689_s14  ;;  %v891_v35 = vadd.f32 %v890_v32, %v4063_v57  ;;  %v1002_v36 = vadd.f32 %v1001_v58, %v889_v29 }
 0x124   : > { %v894_v38 = vpop.f32.mrf.mxu0  ;;  %v1519_v60 = vld [vmem:[#allocation2 + $0x20] sm:$0xfe]  ;;  %v4132_v62 = vpop.f32.mrf.mxu1 }
 0x125   : > { %1203 = vst [vmem:[#allocation2 + $0x60] sm:$0xfe] %v1134_v33  ;;  %1205 = vst [vmem:[#allocation2 + $0x70] sm:$0x1] %v1134_v33  ;;  %v1135_v39 = vrot.slane %v4105_v34, 7  ;;  %v4113_v40 = vmax.f32 %v1002_v36, 0.0  ;;  %v895_v41 = vadd.f32 %v894_v38, %v4061_v55  ;;  %v1004_v42 = vadd.f32 %v1003_v61, %v891_v35 }
 0x126   : > { %v896_v44 = vpop.f32.mrf.mxu0  ;;  %v1520_v50 = vld [vmem:[#allocation2 + $0x28] sm:$0xfe]  ;;  %v1522_v51 = vld [vmem:[#allocation2 + $0x38] sm:$0x1]  ;;  %v1521_v61 = vld [vmem:[#allocation2 + $0x30] sm:$0x1]  ;;  %v4145_v8 = vpop.f32.mrf.mxu1 }
 0x127   : > { %1204 = vst [vmem:[#allocation2 + $0x68] sm:$0xfe] %v1135_v39  ;;  %1206 = vst [vmem:[#allocation2 + $0x78] sm:$0x1] %v1135_v39  ;;  %v1136_v45 = vrot.slane %v4113_v40, 7  ;;  %v4119_v46 = vmax.f32 %v1004_v42, 0.0  ;;  %1263 = vrot.lane.b32.xlu0 %v4097_v28, %s3689_s14  ;;  %v897_v47 = vadd.f32 %v896_v44, %v4063_v57  ;;  %v1008_v49 = vadd.f32 %v4067_v1, %v895_v41 }
 0x128   : > { %v898_v53 = vpop.f32.mrf.mxu0  ;;  %v1581_v1 = vmax.f32 %v1519_v60, %v1520_v50  ;;  %v1582_v2 = vmax.f32 %v1521_v61, %v1522_v51  ;;  %v4152_v17 = vpop.f32.mrf.mxu1  ;;  %v4154_v19 = vld [vmem:[#allocation2 + $0x28] sm:$0xff]  ;;  %v1525_v60 = vld [vmem:[#allocation2 + $0x50] sm:$0x1] }
 0x129   : > { %1207 = vst [vmem:[#allocation2 + $0x80] sm:$0xfe] %v1136_v45  ;;  %1209 = vst [vmem:[#allocation2 + $0x90] sm:$0x1] %v1136_v45  ;;  %v1137_v54 = vrot.slane %v4119_v46, 7  ;;  %v4128_v56 = vmax.f32 %v1008_v49, 0.0  ;;  %v899_v58 = vadd.f32 %v898_v53, %v4061_v55  ;;  %v1010_v59 = vadd.f32 %v4072_v6, %v897_v47 }
 0x12a   : > { %v4134_v63 = vld [vmem:[#allocation2 + $0x48] sm:$0xff]  ;;  %v900_v0 = vpop.f32.mrf.mxu0  ;;  %v1647_v20 = vrot.slane %v1581_v1, 1  ;;  %v1648_v23 = vrot.slane %v1582_v2, 1  ;;  %v4165_v29 = vpop.f32.mrf.mxu1  ;;  %v1526_v47 = vld [vmem:[#allocation2 + $0x58] sm:$0x1] }
 0x12b   : > { %1208 = vst [vmem:[#allocation2 + $0x88] sm:$0xfe] %v1137_v54  ;;  %1210 = vst [vmem:[#allocation2 + $0x98] sm:$0x1] %v1137_v54  ;;  %v1138_v4 = vrot.slane %v4128_v56, 7  ;;  %v4137_v5 = vmax.f32 %v1010_v59, 0.0  ;;  %1437 = vrot.lane.b32.xlu1 %v4134_v63, %s3689_s14  ;;  %1327 = vrot.lane.b32.xlu0 %v4105_v34, %s3689_s14  ;;  %v901_v6 = vadd.f32 %v900_v0, %v4063_v57 }
 0x12c   : > { %v1012_v7 = vadd.f32 %v4080_v12, %v899_v58  ;;  %v904_v10 = vpop.f32.mrf.mxu0  ;;  %v4172_v38 = vpop.f32.mrf.mxu1  ;;  %v1649_v39 = vsel %vm1643_vm2, %v1647_v20, %v1648_v23  ;;  %v1524_v45 = vld [vmem:[#allocation2 + $0x48] sm:$0xfe]  ;;  %v1523_v59 = vld [vmem:[#allocation2 + $0x40] sm:$0xfe]  ;;  %v1584_v0 = vmax.f32 %v1525_v60, %v1526_v47 }
 0x12d   : > { %1211 = vst [vmem:[#allocation2 + $0xa0] sm:$0xfe] %v1138_v4  ;;  %1213 = vst [vmem:[#allocation2 + $0xb0] sm:$0x1] %v1138_v4  ;;  %v1139_v11 = vrot.slane %v4137_v5, 7  ;;  %v1014_v14 = vadd.f32 %v4086_v18, %v901_v6  ;;  %v905_v16 = vadd.f32 %v904_v10, %v4061_v55 }
 0x12e   : > { %v4148_v13 = vmax.f32 %v1012_v7, 0.0  ;;  %v906_v12 = vpop.f32.mrf.mxu0  ;;  %v4185_v49 = vpop.f32.mrf.mxu1  ;;  %v4208_v20 = vld [vmem:[#allocation2 + $0x68] sm:$0xff] }
 0x12f   : > { %1212 = vst [vmem:[#allocation2 + $0xa8] sm:$0xfe] %v1139_v11  ;;  %1214 = vst [vmem:[#allocation2 + $0xb8] sm:$0x1] %v1139_v11  ;;  %v4157_v26 = vmax.f32 %v1014_v14, 0.0  ;;  %1792 = vrot.lane.b32.xlu1 %v4134_v63, %s3689_s14  ;;  %1435 = vrot.lane.b32.xlu0 %v4154_v19, %s3689_s14  ;;  %v907_v18 = vadd.f32 %v906_v12, %v4063_v57  ;;  %v1018_v27 = vadd.f32 %v4094_v25, %v905_v16 }
 0x130   : > { %v1140_v24 = vrot.slane %v4148_v13, 7  ;;  %v908_v30 = vpop.f32.mrf.mxu0  ;;  %v4191_v61 = vpop.f32.mrf.mxu1  ;;  %v1651_v12 = vrot.slane %v1584_v0, 1  ;;  %v1529_v0 = vld [vmem:[#allocation2 + $0x70] sm:$0x1] }
 0x131   : > { %v1141_v32 = vrot.slane %v4157_v26, 7  ;;  %v4168_v33 = vmax.f32 %v1018_v27, 0.0  ;;  %v909_v35 = vadd.f32 %v908_v30, %v4061_v55  ;;  %v1020_v36 = vadd.f32 %v4102_v31, %v907_v18 }
 0x132   : > { %1215 = vst [vmem:[#allocation2 + $0xc0] sm:$0xfe] %v1140_v24  ;;  %1217 = vst [vmem:[#allocation2 + $0xd0] sm:$0x1] %v1140_v24  ;;  %v910_v41 = vpop.f32.mrf.mxu0  ;;  %v4201_v7 = vpop.f32.mrf.mxu1 }
 0x133   : > { %1216 = vst [vmem:[#allocation2 + $0xc8] sm:$0xfe] %v1141_v32  ;;  %1218 = vst [vmem:[#allocation2 + $0xd8] sm:$0x1] %v1141_v32  ;;  %1265 = vrot.lane.b32.xlu0 %v4113_v40, %s3689_s14  ;;  %1694 = vrot.lane.b32.xlu1 %v1649_v39, %s3689_s14  ;;  %v1142_v25 = vrot.slane %v4168_v33, 7  ;;  %v4179_v42 = vmax.f32 %v1020_v36, 0.0  ;;  %v911_v44 = vadd.f32 %v910_v41, %v4063_v57 }
 0x134   : > { %v4183_v31 = vadd.f32 %v4110_v37, %v909_v35  ;;  %v914_v50 = vpop.f32.mrf.mxu0  ;;  %v1583_v37 = vmax.f32 %v1523_v59, %v1524_v45  ;;  %v4219_v32 = vpop.f32.mrf.mxu1 }
 0x135   : > { %1219 = vst [vmem:[#allocation2 + $0xe0] sm:$0xfe] %v1142_v25  ;;  %1221 = vst [vmem:[#allocation2 + $0xf0] sm:$0x1] %v1142_v25  ;;  %v1143_v51 = vrot.slane %v4179_v42, 7  ;;  %v915_v54 = vadd.f32 %v914_v50, %v4061_v55  ;;  %v1024_v58 = vadd.f32 %v4116_v43, %v911_v44 }
 0x136   : > { %5133 = vst [vmem:[#allocation7_spill] sm:$0xff] %v4183_v31  ;;  %v916_v1 = vpop.f32.mrf.mxu0  ;;  %v1650_v23 = vrot.slane %v1583_v37, 1  ;;  %v1527_v37 = vld [vmem:[#allocation2 + $0x60] sm:$0xfe] }
 0x137   : > { %1790 = vrot.lane.b32.xlu0 %v4154_v19, %s3689_s14  ;;  %1269 = vrot.lane.b32.xlu1 %v4148_v13, %s3689_s14  ;;  %1220 = vst [vmem:[#allocation2 + $0xe8] sm:$0xfe] %v1143_v51  ;;  %1222 = vst [vmem:[#allocation2 + $0xf8] sm:$0x1] %v1143_v51  ;;  %v4197_v2 = vmax.f32 %v1024_v58, 0.0  ;;  %v917_v4 = vadd.f32 %v916_v1, %v4063_v57  ;;  %v1028_v43 = vadd.f32 %v4125_v52, %v915_v54  ;;  %v1051_v51 = vpop.f32.mrf.mxu1 }
 0x138   : > { %v918_v6 = vpop.f32.mrf.mxu0  ;;  %v1652_v25 = vsel %vm1643_vm2, %v1650_v23, %v1651_v12 }
 0x139   : > { %5134 = vst [vmem:[#allocation8_spill] sm:$0xff] %v4197_v2  ;;  %v1145_v10 = vrot.slane %v4197_v2, 7  ;;  %v4204_v11 = vmax.f32 %v1028_v43, 0.0  ;;  %v919_v14 = vadd.f32 %v918_v6, %v4061_v55  ;;  %v1030_v16 = vadd.f32 %v4132_v62, %v917_v4  ;;  %v1530_v4 = vld [vmem:[#allocation2 + $0x78] sm:$0x1] }
 0x13a   : > { %v920_v24 = vpop.f32.mrf.mxu0 }
 0x13b   : > { %1329 = vrot.lane.b32.xlu0 %v4119_v46, %s3689_s14  ;;  %1794 = vrot.lane.b32.xlu1 %v4208_v20, %s3689_s14  ;;  %1224 = vst [vmem:[#allocation2 + $0x108] sm:$0xfe] %v1145_v10  ;;  %v1146_v52 = vrot.slane %v4204_v11, 7  ;;  %v4215_v18 = vmax.f32 %v1030_v16, 0.0  ;;  %v921_v27 = vadd.f32 %v920_v24, %v4063_v57  ;;  %v1032_v62 = vadd.f32 %v4145_v8, %v919_v14  ;;  %v1053_v16 = vpop.f32.mrf.mxu1 }
 0x13c   : > { %v924_v30 = vpop.f32.mrf.mxu0 }
 0x13d   : > { %1227 = vst [vmem:[#allocation2 + $0x140] sm:$0xfe] %v1146_v52  ;;  %1229 = vst [vmem:[#allocation2 + $0x150] sm:$0x1] %v1146_v52  ;;  %v1147_v35 = vrot.slane %v4215_v18, 7  ;;  %v4222_v36 = vmax.f32 %v1032_v62, 0.0  ;;  %v1034_v39 = vadd.f32 %v4152_v17, %v921_v27  ;;  %v925_v41 = vadd.f32 %v924_v30, %v4061_v55 }
 0x13e   : > { %v926_v44 = vpop.f32.mrf.mxu0  ;;  %v1586_v62 = vmax.f32 %v1529_v0, %v1530_v4 }
 0x13f   : > { %1267 = vrot.lane.b32.xlu0 %v4128_v56, %s3689_s14  ;;  %1696 = vrot.lane.b32.xlu1 %v1652_v25, %s3689_s14  ;;  %1228 = vst [vmem:[#allocation2 + $0x148] sm:$0xfe] %v1147_v35  ;;  %1230 = vst [vmem:[#allocation2 + $0x158] sm:$0x1] %v1147_v35  ;;  %v1148_v8 = vrot.slane %v4222_v36, 7  ;;  %v4231_v45 = vmax.f32 %v1034_v39, 0.0  ;;  %v927_v47 = vadd.f32 %v926_v44, %v4063_v57  ;;  %v1057_v35 = vpop.f32.mrf.mxu1 }
 0x140   : > { %v1038_v17 = vadd.f32 %v4165_v29, %v925_v41  ;;  %v928_v50 = vpop.f32.mrf.mxu0  ;;  %v1528_v29 = vld [vmem:[#allocation2 + $0x68] sm:$0xfe] }
 0x141   : > { %1231 = vst [vmem:[#allocation2 + $0x160] sm:$0xfe] %v1148_v8  ;;  %1233 = vst [vmem:[#allocation2 + $0x170] sm:$0x1] %v1148_v8  ;;  %v1149_v54 = vrot.slane %v4231_v45, 7  ;;  %v929_v59 = vadd.f32 %v928_v50, %v4061_v55  ;;  %v1040_v60 = vadd.f32 %v4172_v38, %v927_v47  ;;  %v1585_v27 = vmax.f32 %v1527_v37, %v1528_v29  ;;  %v4268_v50 = vld [vmem:[#allocation2 + $0x88] sm:$0xff]  ;;  %v1059_v37 = vpop.f32.mrf.mxu1 }
 0x142   : > { %v4236_v58 = vmax.f32 %v1038_v17, 0.0  ;;  %v930_v1 = vpop.f32.mrf.mxu0 }
 0x143   : > { %1331 = vrot.lane.b32.xlu0 %v4137_v5, %s3689_s14  ;;  %1333 = vrot.lane.b32.xlu1 %v4157_v26, %s3689_s14  ;;  %1232 = vst [vmem:[#allocation2 + $0x168] sm:$0xfe] %v1149_v54  ;;  %1234 = vst [vmem:[#allocation2 + $0x178] sm:$0x1] %v1149_v54  ;;  %v4245_v6 = vmax.f32 %v1040_v60, 0.0  ;;  %v931_v10 = vadd.f32 %v930_v1, %v4063_v57  ;;  %v1042_v38 = vadd.f32 %v4185_v49, %v929_v59 }
 0x144   : > { %v1150_v43 = vrot.slane %v4236_v58, 7  ;;  %v934_v14 = vpop.f32.mrf.mxu0  ;;  %v1653_v54 = vrot.slane %v1585_v27, 1  ;;  %v1654_v59 = vrot.slane %v1586_v62, 1  ;;  %v1061_v27 = vpop.f32.mrf.mxu1  ;;  %v1534_v62 = vld [vmem:[#allocation2 + $0x98] sm:$0x1] }
 0x145   : > { %v1151_v23 = vrot.slane %v4245_v6, 7  ;;  %v4250_v12 = vmax.f32 %v1042_v38, 0.0  ;;  %v935_v24 = vadd.f32 %v934_v14, %v4061_v55  ;;  %v1044_v52 = vadd.f32 %v4191_v61, %v931_v10 }
 0x146   : > { %1235 = vst [vmem:[#allocation2 + $0x180] sm:$0xfe] %v1150_v43  ;;  %1237 = vst [vmem:[#allocation2 + $0x190] sm:$0x1] %v1150_v43  ;;  %v936_v30 = vpop.f32.mrf.mxu0  ;;  %v1655_v14 = vsel %vm1643_vm2, %v1653_v54, %v1654_v59 }
 0x147   : > { %5135 = vst [vmem:[#allocation9_spill] sm:$0xff] %v4250_v12  ;;  %1439 = vrot.lane.b32.xlu0 %v4208_v20, %s3689_s14  ;;  %1271 = vrot.lane.b32.xlu1 %v4168_v33, %s3689_s14  ;;  %1236 = vst [vmem:[#allocation2 + $0x188] sm:$0xfe] %v1151_v23  ;;  %v1152_v49 = vrot.slane %v4250_v12, 7  ;;  %v4259_v39 = vmax.f32 %v1044_v52, 0.0  ;;  %v937_v41 = vadd.f32 %v936_v30, %v4063_v57 }
 0x148   : > { %1238 = vst [vmem:[#allocation2 + $0x198] sm:$0x1] %v1151_v23  ;;  %v1048_v61 = vadd.f32 %v4201_v7, %v935_v24  ;;  %v938_v25 = vpop.f32.mrf.mxu0  ;;  %v1531_v23 = vld [vmem:[#allocation2 + $0x80] sm:$0xfe]  ;;  %v1533_v24 = vld [vmem:[#allocation2 + $0x90] sm:$0x1] }
 0x149   : > { %5136 = vst [vmem:[#allocation10_spill] sm:$0xff] %v4259_v39  ;;  %1239 = vst [vmem:[#allocation2 + $0x1a0] sm:$0xfe] %v1152_v49  ;;  %v1153_v44 = vrot.slane %v4259_v39, 7  ;;  %v939_v47 = vadd.f32 %v938_v25, %v4061_v55  ;;  %v1050_v17 = vadd.f32 %v4219_v32, %v937_v41 }
 0x14a   : > { %1241 = vst [vmem:[#allocation2 + $0x1b0] sm:$0x1] %v1152_v49  ;;  %v4264_v8 = vmax.f32 %v1048_v61, 0.0  ;;  %v940_v60 = vpop.f32.mrf.mxu0  ;;  %v4290_v61 = vld [vmem:[#allocation2 + $0x148] sm:$0xff] }
 0x14b   : > { %1441 = vrot.lane.b32.xlu0 %v4268_v50, %s3689_s14  ;;  %1796 = vrot.lane.b32.xlu1 %v4268_v50, %s3689_s14  ;;  %1240 = vst [vmem:[#allocation2 + $0x1a8] sm:$0xfe] %v1153_v44  ;;  %1242 = vst [vmem:[#allocation2 + $0x1b8] sm:$0x1] %v1153_v44  ;;  %v4275_v0 = vmax.f32 %v1050_v17, 0.0  ;;  %v941_v32 = vadd.f32 %v940_v60, %v4063_v57  ;;  %v1052_v1 = vadd.f32 %v1051_v51, %v939_v47 }
 0x14c   : > { %v1154_v7 = vrot.slane %v4264_v8, 7  ;;  %v944_v29 = vpop.f32.mrf.mxu0  ;;  %v1532_v51 = vld [vmem:[#allocation2 + $0x88] sm:$0xfe]  ;;  %v1588_v60 = vmax.f32 %v1533_v24, %v1534_v62 }
 0x14d   : > { %v1155_v4 = vrot.slane %v4275_v0, 7  ;;  %v4279_v43 = vmax.f32 %v1052_v1, 0.0  ;;  %v1054_v10 = vadd.f32 %v1053_v16, %v941_v32  ;;  %v945_v38 = vadd.f32 %v944_v29, %v4061_v55  ;;  %v1553_v32 = vld [vmem:[#allocation2 + $0x150] sm:$0x1]  ;;  %v1063_v29 = vpop.f32.mrf.mxu1 }
 0x14e   : > { %1243 = vst [vmem:[#allocation2 + $0x1c0] sm:$0xfe] %v1154_v7  ;;  %1245 = vst [vmem:[#allocation2 + $0x1d0] sm:$0x1] %v1154_v7  ;;  %v946_v52 = vpop.f32.mrf.mxu0  ;;  %v1587_v59 = vmax.f32 %v1531_v23, %v1532_v51  ;;  %v1551_v7 = vld [vmem:[#allocation2 + $0x140] sm:$0xfe] }
 0x14f   : > { %1339 = vrot.lane.b32.xlu0 %v4215_v18, %s3689_s14  ;;  %1698 = vrot.lane.b32.xlu1 %v1655_v14, %s3689_s14  ;;  %1244 = vst [vmem:[#allocation2 + $0x1c8] sm:$0xfe] %v1155_v4  ;;  %1246 = vst [vmem:[#allocation2 + $0x1d8] sm:$0x1] %v1155_v4  ;;  %v1156_v30 = vrot.slane %v4279_v43, 7  ;;  %v4287_v16 = vmax.f32 %v1054_v10, 0.0  ;;  %v947_v49 = vadd.f32 %v946_v52, %v4063_v57 }
 0x150   : > { %v1058_v41 = vadd.f32 %v1057_v35, %v945_v38  ;;  %v948_v25 = vpop.f32.mrf.mxu0  ;;  %v1552_v35 = vld [vmem:[#allocation2 + $0x148] sm:$0xfe]  ;;  %v1554_v4 = vld [vmem:[#allocation2 + $0x158] sm:$0x1]  ;;  %v1656_v51 = vrot.slane %v1587_v59, 1  ;;  %v1657_v62 = vrot.slane %v1588_v60, 1 }
 0x151   : > { %1247 = vst [vmem:[#allocation2 + $0x1e0] sm:$0xfe] %v1156_v30  ;;  %1249 = vst [vmem:[#allocation2 + $0x1f0] sm:$0x1] %v1156_v30  ;;  %v1157_v44 = vrot.slane %v4287_v16, 7  ;;  %v949_v17 = vadd.f32 %v948_v25, %v4061_v55  ;;  %v1060_v54 = vadd.f32 %v1059_v37, %v947_v49  ;;  %v4308_v52 = vld [vmem:[#allocation2 + $0xa8] sm:$0xff]  ;;  %v1597_v30 = vmax.f32 %v1551_v7, %v1552_v35 }
 0x152   : > { %v4293_v47 = vmax.f32 %v1058_v41, 0.0  ;;  %v950_v1 = vpop.f32.mrf.mxu0  ;;  %v1598_v49 = vmax.f32 %v1553_v32, %v1554_v4  ;;  %v4317_v41 = vld [vmem:[#allocation2 + $0x168] sm:$0xff]  ;;  %v1658_v25 = vsel %vm1643_vm2, %v1656_v51, %v1657_v62  ;;  %v1537_v60 = vld [vmem:[#allocation2 + $0xb0] sm:$0x1]  ;;  %v1538_v7 = vld [vmem:[#allocation2 + $0xb8] sm:$0x1] }
 0x153   : > { %1451 = vrot.lane.b32.xlu0 %v4290_v61, %s3689_s14  ;;  %1335 = vrot.lane.b32.xlu1 %v4179_v42, %s3689_s14  ;;  %1248 = vst [vmem:[#allocation2 + $0x1e8] sm:$0xfe] %v1157_v44  ;;  %1250 = vst [vmem:[#allocation2 + $0x1f8] sm:$0x1] %v1157_v44  ;;  %v4301_v55 = vmax.f32 %v1060_v54, 0.0  ;;  %v951_v37 = vadd.f32 %v950_v1, %v4063_v57  ;;  %v4304_v38 = vadd.f32 %v1061_v27, %v949_v17 }
 0x154   : > { %5137 = vst [vmem:[#allocation11_spill] sm:$0xff] %v4293_v47  ;;  %v1158_v10 = vrot.slane %v4293_v47, 7  ;;  %v1671_v44 = vrot.slane %v1597_v30, 1  ;;  %v1672_v17 = vrot.slane %v1598_v49, 1  ;;  %v1535_v54 = vld [vmem:[#allocation2 + $0xa0] sm:$0xfe] }
 0x155   : > { %5138 = vst [vmem:[#allocation12_spill] sm:$0xff] %v4301_v55  ;;  %5139 = vst [vmem:[#allocation13_spill] sm:$0xff] %v4304_v38  ;;  %v1159_v14 = vrot.slane %v4301_v55, 7  ;;  %v1064_v24 = vadd.f32 %v1063_v29, %v951_v37  ;;  %v1536_v59 = vld [vmem:[#allocation2 + $0xa8] sm:$0xfe]  ;;  %v1590_v29 = vmax.f32 %v1537_v60, %v1538_v7 }
 0x156   : > { %1251 = vst [vmem:[#allocation2 + $0x200] sm:$0xfe] %v1158_v10  ;;  %1253 = vst [vmem:[#allocation2 + $0x210] sm:$0x1] %v1158_v10  ;;  %v1673_v32 = vsel %vm1643_vm2, %v1671_v44, %v1672_v17  ;;  %v1589_v1 = vmax.f32 %v1535_v54, %v1536_v59  ;;  %v1555_v35 = vld [vmem:[#allocation2 + $0x160] sm:$0xfe] }
 0x157   : > { %1806 = vrot.lane.b32.xlu0 %v4290_v61, %s3689_s14  ;;  %1443 = vrot.lane.b32.xlu1 %v4308_v52, %s3689_s14  ;;  %1252 = vst [vmem:[#allocation2 + $0x208] sm:$0xfe] %v1159_v14  ;;  %1254 = vst [vmem:[#allocation2 + $0x218] sm:$0x1] %v1159_v14  ;;  %v4314_v57 = vmax.f32 %v1064_v24, 0.0  ;;  %v4327_v14 = vld [vmem:[#allocation2 + $0xc8] sm:$0xff] }
 0x158   : > { %v1556_v4 = vld [vmem:[#allocation2 + $0x168] sm:$0xfe]  ;;  %v1557_v10 = vld [vmem:[#allocation2 + $0x170] sm:$0x1]  ;;  %v1558_v37 = vld [vmem:[#allocation2 + $0x178] sm:$0x1] }
 0x159   : > { %5140 = vst [vmem:[#allocation14_spill] sm:$0xff] %v4314_v57  ;;  %v1161_v27 = vrot.slane %v4314_v57, 7  ;;  %v1659_v24 = vrot.slane %v1589_v1, 1  ;;  %v1660_v51 = vrot.slane %v1590_v29, 1  ;;  %v1599_v62 = vmax.f32 %v1555_v35, %v1556_v4  ;;  %v4333_v49 = vld [vmem:[#allocation2 + $0x188] sm:$0xff]  ;;  %v3121_v17 = vld [vmem:[%s5110_s3 + $0x78] sm:$0xff] }
 0x15a   : > { %v1600_v30 = vmax.f32 %v1557_v10, %v1558_v37  ;;  %3277 = vmatpush3.msra.mxu1 %v3121_v17  ;;  %v4347_v59 = vld [vmem:[#allocation2 + $0xe8] sm:$0xff]  ;;  %v1559_v60 = vld [vmem:[#allocation2 + $0x180] sm:$0xfe]  ;;  %v1562_v1 = vld [vmem:[#allocation2 + $0x198] sm:$0x1] }
 0x15b   : > { %1808 = vrot.lane.b32.xlu0 %v4317_v41, %s3689_s14  ;;  %1700 = vrot.lane.b32.xlu1 %v1658_v25, %s3689_s14  ;;  %1256 = vst [vmem:[#allocation2 + $0x228] sm:$0xfe] %v1161_v27  ;;  %v1661_v27 = vsel %vm1643_vm2, %v1659_v24, %v1660_v51  ;;  %v1674_v25 = vrot.slane %v1599_v62, 1  ;;  %v1560_v7 = vld [vmem:[#allocation2 + $0x188] sm:$0xfe]  ;;  %v3120_v29 = vld [vmem:[%s5110_s3 + $0x70] sm:$0xff] }
 0x15c   : > { %v1675_v44 = vrot.slane %v1600_v30, 1  ;;  %3278 = vmatprep.subr.mxu1 %v5113_v22  ;;  %v1601_v35 = vmax.f32 %v1559_v60, %v1560_v7  ;;  %v4361_v10 = vld [vmem:[#allocation2 + $0x1a8] sm:$0xff]  ;;  %v1563_v30 = vld [vmem:[#allocation2 + $0x1a0] sm:$0xfe]  ;;  %v3131_v7 = vld [vmem:[%s5110_s3 + $0xb8] sm:$0xff] }
 0x15d   : > { %3279 = vmatpush3.msra.mxu1 %v3120_v29  ;;  %v3119_v51 = vld [vmem:[%s5110_s3 + $0x68] sm:$0xff]  ;;  %3315 = vmatpush3.msra.mxu0 %v3131_v7  ;;  %v1571_v53 = vld [vmem:[#allocation2 + $0x1e0] sm:$0xfe]  ;;  %v1542_v23 = vld [vmem:[#allocation2 + $0xd8] sm:$0x1] }
 0x15e   : > { %v1676_v54 = vsel %vm1643_vm2, %v1674_v25, %v1675_v44  ;;  %3280 = vmatprep.subr.mxu1 %v5113_v22  ;;  %v1677_v37 = vrot.slane %v1601_v35, 1  ;;  %v1565_v25 = vld [vmem:[#allocation2 + $0x1b0] sm:$0x1]  ;;  %v1566_v44 = vld [vmem:[#allocation2 + $0x1b8] sm:$0x1]  ;;  %v4379_v17 = vld [vmem:[#allocation2 + $0x1c8] sm:$0xff]  ;;  %3316 = vmatprep.subr.mxu0 %v5113_v22 }
 0x15f   : > { %1710 = vrot.lane.b32.xlu0 %v1673_v32, %s3689_s14  ;;  %1275 = vrot.lane.b32.xlu1 %v4204_v11, %s3689_s14  ;;  %v1561_v32 = vld [vmem:[#allocation2 + $0x190] sm:$0x1]  ;;  %5141 = vst [vmem:[#allocation15_spill] sm:$0xff] %v4379_v17  ;;  %v1604_v60 = vmax.f32 %v1565_v25, %v1566_v44  ;;  %v1567_v35 = vld [vmem:[#allocation2 + $0x1c0] sm:$0xfe] }
 0x160   : > { %v1602_v4 = vmax.f32 %v1561_v32, %v1562_v1  ;;  %3281 = vmatpush3.msra.mxu1 %v3119_v51  ;;  %v3118_v32 = vld [vmem:[%s5110_s3 + $0x60] sm:$0xff]  ;;  %v1569_v51 = vld [vmem:[#allocation2 + $0x1d0] sm:$0x1] }
 0x161   : > { %3282 = vmatprep.subr.mxu1 %v5113_v22  ;;  %v1681_v29 = vrot.slane %v1604_v60, 1  ;;  %v1539_v44 = vld [vmem:[#allocation2 + $0xc0] sm:$0xfe]  ;;  %v1541_v60 = vld [vmem:[#allocation2 + $0xd0] sm:$0x1] }
 0x162   : > { %v1678_v24 = vrot.slane %v1602_v4, 1  ;;  %3283 = vmatpush3.msra.mxu1 %v3118_v32  ;;  %v4395_v4 = vpop.permute.xlu0 %3493 }
 0x163   : > { %1285 = vrot.lane.b32.xlu0 %v4279_v43, %s3689_s14  ;;  %1445 = vrot.lane.b32.xlu1 %v4327_v14, %s3689_s14 }
 0x164   : > { %v1679_v62 = vsel %vm1643_vm2, %v1677_v37, %v1678_v24  ;;  %v4397_v37 = vpop.permute.xlu1 %1788  ;;  %v1568_v24 = vld [vmem:[#allocation2 + $0x1c8] sm:$0xfe]  ;;  %3284 = vmatprep.subr.mxu1 %v5113_v22  ;;  %v3130_v22 = vld [vmem:[%s5110_s3 + $0xb0] sm:$0xff] }
 0x165   : > { %3317 = vmatpush3.msra.mxu0 %v3130_v22 }
 0x167   : > { %1810 = vrot.lane.b32.xlu0 %v4333_v49, %s3689_s14  ;;  %1702 = vrot.lane.b32.xlu1 %v1661_v27, %s3689_s14  ;;  %v1564_v27 = vld [vmem:[#allocation2 + $0x1a8] sm:$0xfe] }
 0x168   : > { %v4405_v32 = vpop.permute.xlu1 %1804 }
 0x169   : > { %5142 = vst [vmem:[#allocation16_spill] sm:$0xff] %v4405_v32  ;;  %v1592_v32 = vmax.f32 %v1541_v60, %v1542_v23 }
 0x16b   : > { %1712 = vrot.lane.b32.xlu0 %v1676_v54, %s3689_s14  ;;  %1277 = vrot.lane.b32.xlu1 %v4222_v36, %s3689_s14  ;;  %v1603_v54 = vmax.f32 %v1563_v30, %v1564_v27  ;;  %v1605_v27 = vmax.f32 %v1567_v35, %v1568_v24  ;;  %v1572_v24 = vld [vmem:[#allocation2 + $0x1e8] sm:$0xfe] }
 0x16d   : > { %v1680_v1 = vrot.slane %v1603_v54, 1  ;;  %v1540_v54 = vld [vmem:[#allocation2 + $0xc8] sm:$0xfe] }
 0x16f   : > { %1349 = vrot.lane.b32.xlu0 %v4287_v16, %s3689_s14  ;;  %1447 = vrot.lane.b32.xlu1 %v4347_v59, %s3689_s14  ;;  %v1682_v30 = vsel %vm1643_vm2, %v1680_v1, %v1681_v29  ;;  %v4410_v1 = vld [vmem:[#allocation2 + $0x1e8] sm:$0xff]  ;;  %v1683_v29 = vrot.slane %v1605_v27, 1  ;;  %v3117_v27 = vld [vmem:[%s5110_s3 + $0x58] sm:$0xff] }
 0x170   : > { %3285 = vmatpush3.msra.mxu1 %v3117_v27 }
 0x173   : > { %1287 = vrot.lane.b32.xlu0 %v4293_v47, %s3689_s14  ;;  %1341 = vrot.lane.b32.xlu1 %v4231_v45, %s3689_s14  ;;  %v1607_v47 = vmax.f32 %v1571_v53, %v1572_v24 }
 0x175   : > { %v1686_v60 = vrot.slane %v1607_v47, 1 }
 0x177   : > { %1812 = vrot.lane.b32.xlu0 %v4361_v10, %s3689_s14  ;;  %1279 = vrot.lane.b32.xlu1 %v4236_v58, %s3689_s14 }
 0x17b   : > { %1714 = vrot.lane.b32.xlu0 %v1679_v62, %s3689_s14  ;;  %1343 = vrot.lane.b32.xlu1 %v4245_v6, %s3689_s14  ;;  %v1570_v62 = vld [vmem:[#allocation2 + $0x1d8] sm:$0x1] }
 0x17c   : > { %v1606_v25 = vmax.f32 %v1569_v51, %v1570_v62  ;;  %v1573_v51 = vld [vmem:[#allocation2 + $0x1f0] sm:$0x1]  ;;  %v1574_v62 = vld [vmem:[#allocation2 + $0x1f8] sm:$0x1] }
 0x17e   : > { %v1684_v35 = vrot.slane %v1606_v25, 1 }
 0x17f   : > { %1351 = vrot.lane.b32.xlu0 %v4301_v55, %s3689_s14  ;;  %1281 = vrot.lane.b32.xlu1 %v4250_v12, %s3689_s14  ;;  %v1591_v55 = vmax.f32 %v1539_v44, %v1540_v54  ;;  %v1663_v54 = vrot.slane %v1592_v32, 1 }
 0x180   : > { %v1685_v12 = vsel %vm1643_vm2, %v1683_v29, %v1684_v35  ;;  %v3116_v29 = vld [vmem:[%s5110_s3 + $0x50] sm:$0xff] }
 0x181   : > { %v1662_v44 = vrot.slane %v1591_v55, 1 }
 0x183   : > { %1459 = vrot.lane.b32.xlu0 %v4379_v17, %s3689_s14  ;;  %1345 = vrot.lane.b32.xlu1 %v4259_v39, %s3689_s14  ;;  %v1608_v39 = vmax.f32 %v1573_v51, %v1574_v62  ;;  %v1664_v47 = vsel %vm1643_vm2, %v1662_v44, %v1663_v54  ;;  %v1577_v44 = vld [vmem:[#allocation2 + $0x210] sm:$0x1]  ;;  %v3495_v54 = vunpack.i.l.bf16 %v4395_v4 }
 0x187   : > { %1814 = vrot.lane.b32.xlu0 %v4379_v17, %s3689_s14  ;;  %1453 = vrot.lane.b32.xlu1 %v4317_v41, %s3689_s14 }
 0x18b   : > { %1716 = vrot.lane.b32.xlu0 %v1682_v30, %s3689_s14  ;;  %1283 = vrot.lane.b32.xlu1 %v4264_v8, %s3689_s14  ;;  %v5143_v30 = vmov 0.0  }
 0x18c   : > { %3318 = vmatprep.subr.mxu0 %v5143_v30  ;;  %3286 = vmatprep.subr.mxu1 %v5143_v30 }
 0x18d   : > { %v1260_v7 = vpop.permute.xlu0 %1259  ;;  %3287 = vmatpush3.msra.mxu1 %v3116_v29  ;;  %3292 = vmatprep.mubr.msk.f32.mxu1 %vm3690_vm5, %v5143_v30 }
 0x18e   : > { %v1307_v22 = vmax.f32 %v4069_v3, %v1260_v7  ;;  %v1687_v7 = vrot.slane %v1608_v39, 1  ;;  %3288 = vmatprep.subr.mxu1 %v5143_v30  ;;  %3330 = vmatprep.mubr.msk.f32.mxu0 %vm3690_vm5, %v5143_v30 }
 0x18f   : > { %1461 = vrot.lane.b32.xlu0 %v4410_v1, %s3689_s14  ;;  %1347 = vrot.lane.b32.xlu1 %v4275_v0, %s3689_s14 }
 0x190   : > { %v1688_v39 = vsel %vm1643_vm2, %v1686_v60, %v1687_v7  ;;  %v1544_v60 = vld [vmem:[#allocation2 + $0xe8] sm:$0xfe] }
 0x191   : > { %v1324_v48 = vpop.permute.xlu0 %1323 }
 0x192   : > { %v1371_v25 = vmax.f32 %v4075_v9, %v1324_v48  ;;  %v4429_v9 = vld [vmem:[#allocation2 + $0x208] sm:$0xff] }
 0x193   : > { %v1326_v17 = vpop.permute.xlu1 %1325  ;;  %1718 = vrot.lane.b32.xlu0 %v1685_v12, %s3689_s14  ;;  %1455 = vrot.lane.b32.xlu1 %v4333_v49, %s3689_s14  ;;  %v3129_v12 = vld [vmem:[%s5110_s3 + $0xa8] sm:$0xff] }
 0x194   : > { %v1387_v53 = vmax.f32 %v1307_v22, %v1371_v25  ;;  %v1372_v3 = vmax.f32 %v4089_v21, %v1326_v17  ;;  %3319 = vmatpush3.msra.mxu0 %v3129_v12  ;;  %v1575_v25 = vld [vmem:[#allocation2 + $0x200] sm:$0xfe] }
 0x195   : > { %v1262_v23 = vpop.permute.xlu0 %1261  ;;  %3320 = vmatprep.subr.mxu0 %v5143_v30 }
 0x196   : > { %v1308_v48 = vmax.f32 %v4083_v15, %v1262_v23 }
 0x197   : > { %1463 = vrot.lane.b32.xlu0 %v4429_v9, %s3689_s14  ;;  %1457 = vrot.lane.b32.xlu1 %v4361_v10, %s3689_s14 }
 0x198   : > { %v1388_v21 = vmax.f32 %v1308_v48, %v1372_v3  ;;  %v1543_v48 = vld [vmem:[#allocation2 + $0xe0] sm:$0xfe] }
 0x199   : > { %v1264_v15 = vpop.permute.xlu0 %1263 }
 0x19a   : > { %v1309_v32 = vmax.f32 %v4097_v28, %v1264_v15  ;;  %v1576_v28 = vld [vmem:[#allocation2 + $0x208] sm:$0xfe] }
 0x19b   : > { %1720 = vrot.lane.b32.xlu0 %v1688_v39, %s3689_s14  ;;  %1704 = vrot.lane.b32.xlu1 %v1664_v47, %s3689_s14  ;;  %v1609_v29 = vmax.f32 %v1575_v25, %v1576_v28  ;;  %v1545_v47 = vld [vmem:[#allocation2 + $0xf0] sm:$0x1] }
 0x19d   : > { %v1438_v55 = vpop.permute.xlu1 %1437  ;;  %v1328_v17 = vpop.permute.xlu0 %1327 }
 0x19e   : > { %v1484_v35 = vmax.f32 %v4134_v63, %v1438_v55  ;;  %v1373_v24 = vmax.f32 %v4105_v34, %v1328_v17  ;;  %v1578_v63 = vld [vmem:[#allocation2 + $0x218] sm:$0x1]  ;;  %v5144_v34 = vmax.f32 %v4304_v38, 0.0  ;;  %v1593_v17 = vmax.f32 %v1543_v48, %v1544_v60 }
 0x19f   : > { %1816 = vrot.lane.b32.xlu0 %v4410_v1, %s3689_s14  ;;  %1798 = vrot.lane.b32.xlu1 %v4308_v52, %s3689_s14  ;;  %v1546_v55 = vld [vmem:[#allocation2 + $0xf8] sm:$0x1] }
 0x1a0   : > { %v4454_v51 = vmax.f32 %v1309_v32, %v1373_v24  ;;  %v1500_v62 = vmax.f32 %v1388_v21, %v1484_v35  ;;  %v1610_v21 = vmax.f32 %v1577_v44, %v1578_v63  ;;  %v1594_v25 = vmax.f32 %v1545_v47, %v1546_v55  ;;  %v4477_v44 = vld [vmem:[#allocation2 + $0x228] sm:$0xff] }
 0x1a1   : > { %v4456_v27 = vpop.permute.xlu1 %1792  ;;  %v1436_v22 = vpop.permute.xlu0 %1435  ;;  %5146 = vst [vmem:[#allocation17_spill] sm:$0xff] %v4477_v44 }
 0x1a2   : > { %v1483_v23 = vmax.f32 %v4154_v19, %v1436_v22  ;;  %v3128_v19 = vld [vmem:[%s5110_s3 + $0xa0] sm:$0xff]  ;;  %v1690_v22 = vrot.slane %v1610_v21, 1 }
 0x1a3   : > { %1289 = vrot.lane.b32.xlu0 %v5144_v34, %s3689_s14  ;;  %1800 = vrot.lane.b32.xlu1 %v4327_v14, %s3689_s14 }
 0x1a4   : > { %v1499_v3 = vmax.f32 %v1387_v53, %v1483_v23  ;;  %3321 = vmatpush3.msra.mxu0 %v3128_v19  ;;  %v5145_v53 = vmax.f32 %v4183_v31, 0.0 }
 0x1a5   : > { %v1266_v7 = vpop.permute.xlu0 %1265  ;;  %v1695_v12 = vpop.permute.xlu1 %1694  ;;  %3322 = vmatprep.subr.mxu0 %v5143_v30 }
 0x1a6   : > { %v1740_v15 = vmax.f32 %v1499_v3, %v3495_v54  ;;  %v1741_v39 = vmax.f32 %v1500_v62, %v1695_v12  ;;  %v1689_v62 = vrot.slane %v1609_v29, 1  ;;  %v1310_v47 = vmax.f32 %v4113_v40, %v1266_v7 }
 0x1a7   : > { %1353 = vrot.lane.b32.xlu0 %v4314_v57, %s3689_s14  ;;  %1273 = vrot.lane.b32.xlu1 %v5145_v53, %s3689_s14 }
 0x1a8   : > { %v1836_v32 = vmax.f32 %v1740_v15, %v4397_v37  ;;  %v1665_v37 = vrot.slane %v1593_v17, 1  ;;  %v1691_v19 = vsel %vm1643_vm2, %v1689_v62, %v1690_v22  ;;  %v1666_v15 = vrot.slane %v1594_v25, 1  ;;  %v3126_v62 = vld [vmem:[%s5110_s3 + $0x90] sm:$0xff] }
 0x1a9   : > { %v1791_v35 = vpop.permute.xlu0 %1790  ;;  %v4475_v24 = vpop.permute.xlu1 %1269 }
 0x1aa   : > { %v2112_v23 = vrot.slane %v1836_v32, 1  ;;  %v1837_v28 = vmax.f32 %v1741_v39, %v1791_v35  ;;  %v1853_v63 = vsel %vm1852_vm3, %v1836_v32, 0.0  ;;  %v1900_v34 = vsel %vm1899_vm4, %v1836_v32, 0.0  ;;  %v3127_v39 = vld [vmem:[%s5110_s3 + $0x98] sm:$0xff]  ;;  %v4509_v32 = vld [vmem:[#allocation2 + $0x108] sm:$0xff] }
 0x1ab   : > { %1465 = vrot.lane.b32.xlu0 %v4477_v44, %s3689_s14  ;;  %1337 = vrot.lane.b32.xlu1 %v4197_v2, %s3689_s14  ;;  %5147 = vst [vmem:[#allocation18_spill] sm:$0xff] %v4509_v32  ;;  %v3115_v35 = vld [vmem:[%s5110_s3 + $0x48] sm:$0xff] }
 0x1ac   : > { %v4486_v54 = vsel %vm1852_vm3, %v1837_v28, 0.0  ;;  %v4489_v3 = vsel %vm1899_vm4, %v1837_v28, 0.0  ;;  %v2113_v48 = vrot.slane %v1837_v28, 1  ;;  %v2140_v55 = vsel %vm1852_vm3, %v2112_v23, 0.0  ;;  %3323 = vmatpush3.msra.mxu0 %v3127_v39  ;;  %3289 = vmatpush3.msra.mxu1 %v3115_v35  ;;  %v3125_v28 = vld [vmem:[%s5110_s3 + $0x88] sm:$0xff] }
 0x1ad   : > { %v4492_v60 = vadd.f32 %v4486_v54, %v1853_v63  ;;  %v4495_v12 = vadd.f32 %v4489_v3, %v1900_v34  ;;  %v1330_v29 = vpop.permute.xlu0 %1329  ;;  %v4497_v21 = vpop.permute.xlu1 %1794  ;;  %3324 = vmatprep.subr.mxu0 %v5143_v30  ;;  %3290 = vmatprep.subr.mxu1 %v5143_v30  ;;  %v1667_v23 = vsel %vm1643_vm2, %v1665_v37, %v1666_v15  ;;  %v3124_v63 = vld [vmem:[%s5110_s3 + $0x80] sm:$0xff] }
 0x1ae   : > { %v4506_v53 = vsel %vm1852_vm3, %v2113_v48, 0.0  ;;  %v1374_v17 = vmax.f32 %v4119_v46, %v1330_v29  ;;  %v3114_v46 = vld [vmem:[%s5110_s3 + $0x40] sm:$0xff]  ;;  %3325 = vmatpush3.msra.mxu0 %v3126_v62  ;;  %v1312_v48 = vmax.f32 %v4148_v13, %v4475_v24 }
 0x1af   : > { %v2142_v40 = vadd.f32 %v4506_v53, %v2140_v55  ;;  %1722 = vrot.lane.b32.xlu0 %v1691_v19, %s3689_s14  ;;  %1449 = vrot.lane.b32.xlu1 %v4509_v32, %s3689_s14 }
 0x1b0   : > { %v1390_v7 = vmax.f32 %v1310_v47, %v1374_v17  ;;  %3291 = vmatpush3.msra.mxu1 %v3114_v46  ;;  %3326 = vmatprep.subr.mxu0 %v5143_v30 }
 0x1b1   : > { %v1268_v22 = vpop.permute.xlu0 %1267  ;;  %v1697_v25 = vpop.permute.xlu1 %1696  ;;  %3295 = vmatprep.subr.mxu1 %v5143_v30  ;;  %3327 = vmatpush3.msra.mxu0 %v3125_v28 }
 0x1b2   : > { %v1311_v29 = vmax.f32 %v4128_v56, %v1268_v22  ;;  %3328 = vmatprep.subr.mxu0 %v5143_v30 }
 0x1b3   : > { %1818 = vrot.lane.b32.xlu0 %v4429_v9, %s3689_s14  ;;  %1706 = vrot.lane.b32.xlu1 %v1667_v23, %s3689_s14 }
 0x1b4   : > { %3329 = vmatpush3.msra.mxu0 %v3124_v63 }
 0x1b5   : > { %v1332_v37 = vpop.permute.xlu0 %1331  ;;  %v1334_v34 = vpop.permute.xlu1 %1333  ;;  %3352 = vmatprep.subr.mxu0 %v5143_v30 }
 0x1b6   : > { %v1375_v19 = vmax.f32 %v4137_v5, %v1332_v37  ;;  %v1376_v15 = vmax.f32 %v4157_v26, %v1334_v34 }
 0x1b7   : > { %1802 = vrot.lane.b32.xlu1 %v4347_v59, %s3689_s14  ;;  %s218_s14 = sand.u32 1, %s3678_s19  }
 0x1b8   : > { %v1391_v39 = vmax.f32 %v1311_v29, %v1375_v19  ;;  %v4550_v47 = vmax.f32 %v1312_v48, %v1376_v15  ;;  %s3016_s12 = sshll.u32 %s218_s14, 1  ;;  %s5067_s7 = scalar_lea.sflag [#allocation4], %s218_s14 }
 0x1b9   : > { %v1440_v55 = vpop.permute.xlu0 %1439  ;;  %v1272_v17 = vpop.permute.xlu1 %1271  ;;  %s220_s23 = scalar_lea.vmem [#allocation3], %s3016_s12 }
 0x1ba   : > { %v1485_v13 = vmax.f32 %v4208_v20, %v1440_v55  ;;  %v1313_v15 = vmax.f32 %v4168_v33, %v1272_v17  ;;  %s2950_s26 = sshll.u32 %s220_s23, 4  ;;  %s5065_s26 = int_to_ptr.vmem [resolvable:$true] %s2950_s26 }
 0x1bb   : > { %s3626_s22 = scalar_lea.vmem %s5065_s26, 32  ;;  %p3633_p0 = scmp.lt.s32.totalorder %s5065_s26, %s3631_s9 }
 0x1bc   : > { %v1501_v56 = vmax.f32 %v4454_v51, %v1485_v13  ;;  %p3627_p11 = scmp.ne.s32.totalorder %s5065_s26, %s3626_s22  ;;  %p3634_p1 = scmp.lt.s32.totalorder %s3632_s10, %s3626_s22 }
 0x1bd   : > { %v1442_v5 = vpop.permute.xlu0 %1441  ;;  %v1797_v24 = vpop.permute.xlu1 %1796 }
 0x1be   : > { %v1742_v26 = vmax.f32 %v1501_v56, %v1697_v25  ;;  %v1486_v35 = vmax.f32 %v4268_v50, %v1442_v5  ;;  %p3628_p12 = pnand %p3627_p11, %p3763_p5  ;;  %p3635_p2 = por %p3634_p1, %p3633_p0 }
 0x1c0   : > { %v1838_v62 = vmax.f32 %v1742_v26, %v4456_v27  ;;  %v1502_v46 = vmax.f32 %v1390_v7, %v1486_v35  ;;  %p3629_p13 = pneg %p3628_p12 }
 0x1c1   : > { %v4557_v22 = vpop.permute.xlu0 %1339  ;;  %v1699_v23 = vpop.permute.xlu1 %1698 }
 0x1c2   : > { %v2114_v28 = vrot.slane %v1838_v62, 1  ;;  %v1856_v63 = vsel %vm1852_vm3, %v1838_v62, 0.0  ;;  %v1903_v37 = vsel %vm1899_vm4, %v1838_v62, 0.0  ;;  %v1743_v27 = vmax.f32 %v1502_v46, %v1699_v23  ;;  %p3636_p3 = pnand %p3635_p2, %p3629_p13 }
 0x1c3   : > { %v1857_v20 = vadd.f32 %v1856_v63, %v4492_v60  ;;  %v1904_v51 = vadd.f32 %v1903_v37, %v4495_v12  ;;  %v2572_v34 = vadd.f32 %v1856_v63, %v4486_v54  ;;  %v2681_v25 = vadd.f32 %v1903_v37, %v4489_v3 }
 0x1c4   : > { %v2143_v50 = vsel %vm1852_vm3, %v2114_v28, 0.0  ;;  %v1839_v55 = vmax.f32 %v1743_v27, %v4497_v21 }
 0x1c5   : > { %v2144_v7 = vadd.f32 %v2143_v50, %v2142_v40  ;;  %v2790_v48 = vadd.f32 %v2143_v50, %v4506_v53  ;;  %v4567_v29 = vpop.permute.xlu0 %1451  ;;  %v1336_v19 = vpop.permute.xlu1 %1335 }
 0x1c6   : > { %v1377_v60 = vmax.f32 %v4179_v42, %v1336_v19  ;;  %v1858_v12 = vsel %vm1852_vm3, %v1839_v55, 0.0  ;;  %v1905_v54 = vsel %vm1899_vm4, %v1839_v55, 0.0  ;;  %v2115_v3 = vrot.slane %v1839_v55, 1 }
 0x1c7   : > { %v1859_v56 = vadd.f32 %v1858_v12, %v1857_v20  ;;  %v1906_v40 = vadd.f32 %v1905_v54, %v1904_v51  ;;  %v2573_v5 = vadd.f32 %v2572_v34, %v1858_v12  ;;  %v2682_v53 = vadd.f32 %v2681_v25, %v1905_v54 }
 0x1c8   : > { %v4574_v13 = vmax.f32 %v1313_v15, %v1377_v60  ;;  %v2145_v33 = vsel %vm1852_vm3, %v2115_v3, 0.0  ;;  %v1491_v38 = vmax.f32 %v4290_v61, %v4567_v29 }
 0x1c9   : > { %v4576_v26 = vpop.permute.xlu0 %1806  ;;  %v1444_v35 = vpop.permute.xlu1 %1443  ;;  %v2146_v17 = vadd.f32 %v2145_v33, %v2144_v7  ;;  %v2791_v42 = vadd.f32 %v2790_v48, %v2145_v33 }
 0x1ca   : > { %v1487_v21 = vmax.f32 %v4308_v52, %v1444_v35 }
 0x1cc   : > { %v1503_v62 = vmax.f32 %v1391_v39, %v1487_v21 }
 0x1cd   : > { %v4580_v46 = vpop.permute.xlu0 %1808  ;;  %v1701_v23 = vpop.permute.xlu1 %1700 }
 0x1ce   : > { %v1744_v28 = vmax.f32 %v1503_v62, %v1701_v23 }
 0x1d0   : > { %v1840_v63 = vmax.f32 %v1744_v28, %v1797_v24 }
 0x1d1   : > { %v4582_v37 = vpop.permute.xlu0 %1710  ;;  %v1276_v20 = vpop.permute.xlu1 %1275 }
 0x1d2   : > { %v1860_v51 = vsel %vm1852_vm3, %v1840_v63, 0.0  ;;  %v1907_v34 = vsel %vm1899_vm4, %v1840_v63, 0.0  ;;  %v2116_v25 = vrot.slane %v1840_v63, 1  ;;  %v1315_v28 = vmax.f32 %v4204_v11, %v1276_v20 }
 0x1d3   : > { %v4586_v50 = vadd.f32 %v1860_v51, %v1859_v56  ;;  %v4588_v27 = vadd.f32 %v1907_v34, %v1906_v40  ;;  %v4590_v52 = vadd.f32 %v2573_v5, %v1860_v51  ;;  %v4592_v39 = vadd.f32 %v2682_v53, %v1907_v34 }
 0x1d4   : > { %v2147_v7 = vsel %vm1852_vm3, %v2116_v25, 0.0  ;;  %v1379_v25 = vmax.f32 %v4215_v18, %v4557_v22 }
 0x1d5   : > { %v1286_v48 = vpop.permute.xlu0 %1285  ;;  %v1446_v24 = vpop.permute.xlu1 %1445  ;;  %v4595_v19 = vadd.f32 %v2147_v7, %v2146_v17  ;;  %v4597_v15 = vadd.f32 %v2791_v42, %v2147_v7 }
 0x1d6   : > { %v1395_v32 = vmax.f32 %v1315_v28, %v1379_v25  ;;  %v1320_v18 = vmax.f32 %v4279_v43, %v1286_v48 }
 0x1d7   : > { %5148 = vst [vmem:[#allocation19_spill] sm:$0xff] %v4597_v15  ;;  %v3496_v15 = vunpack.i.h.bf16 %v4395_v4 }
 0x1d8   : > { %v1507_v20 = vmax.f32 %v1395_v32, %v1491_v38  ;;  %v5149_v32 = vld [vmem:[#allocation15_spill] sm:$0xff] }
 0x1d9   : > { %v4599_v55 = vpop.permute.xlu0 %1810  ;;  %v4601_v60 = vpop.permute.xlu1 %1702 }
 0x1da   : > { %v1748_v38 = vmax.f32 %v1507_v20, %v3496_v15  ;;  %v5152_v15 = vld [vmem:[#allocation16_spill] sm:$0xff] }
 0x1dd   : > { %v4603_v12 = vpop.permute.xlu0 %1712  ;;  %v1278_v54 = vpop.permute.xlu1 %1277 }
 0x1de   : > { %v1316_v7 = vmax.f32 %v4222_v36, %v1278_v54 }
 0x1e1   : > { %v1350_v3 = vpop.permute.xlu0 %1349  ;;  %v4605_v56 = vpop.permute.xlu1 %1447 }
 0x1e5   : > { %v4607_v40 = vpop.permute.xlu0 %1287  ;;  %v1342_v5 = vpop.permute.xlu1 %1341 }
 0x1e6   : > { %v1380_v63 = vmax.f32 %v4231_v45, %v1342_v5  ;;  %v1384_v45 = vmax.f32 %v4287_v16, %v1350_v3  ;;  %v5150_v3 = vld [vmem:[#allocation10_spill] sm:$0xff] }
 0x1e8   : > { %v1396_v31 = vmax.f32 %v1316_v7, %v1380_v63 }
 0x1e9   : > { %v4609_v53 = vpop.permute.xlu0 %1812  ;;  %v1280_v35 = vpop.permute.xlu1 %1279 }
 0x1ea   : > { %v1317_v16 = vmax.f32 %v4236_v58, %v1280_v35  ;;  %v1844_v35 = vmax.f32 %v1748_v38, %v5152_v15 }
 0x1ed   : > { %v4611_v33 = vpop.permute.xlu0 %1714  ;;  %v1344_v21 = vpop.permute.xlu1 %1343 }
 0x1ee   : > { %v1381_v36 = vmax.f32 %v4245_v6, %v1344_v21  ;;  %v5153_v21 = vld [vmem:[#allocation12_spill] sm:$0xff] }
 0x1f0   : > { %v1397_v6 = vmax.f32 %v1317_v16, %v1381_v36 }
 0x1f1   : > { %v1352_v17 = vpop.permute.xlu0 %1351  ;;  %v1282_v42 = vpop.permute.xlu1 %1281 }
 0x1f5   : > { %v1460_v62 = vpop.permute.xlu0 %1459  ;;  %v1346_v23 = vpop.permute.xlu1 %1345 }
 0x1f6   : > { %v1495_v4 = vmax.f32 %v5149_v32, %v1460_v62  ;;  %v1385_v62 = vmax.f32 %v5153_v21, %v1352_v17  ;;  %v2119_v17 = vrot.slane %v1844_v35, 1 }
 0x1f8   : > { %v2159_v32 = vsel %vm1852_vm3, %v2119_v17, 0.0 }
 0x1f9   : > { %v4615_v51 = vpop.permute.xlu0 %1814  ;;  %v1454_v34 = vpop.permute.xlu1 %1453 }
 0x1fa   : > { %v1492_v30 = vmax.f32 %v4317_v41, %v1454_v34  ;;  %v5154_v34 = vld [vmem:[#allocation11_spill] sm:$0xff] }
 0x1fc   : > { %v1508_v11 = vmax.f32 %v1396_v31, %v1492_v30  ;;  %v1488_v31 = vmax.f32 %v4327_v14, %v1446_v24  ;;  %v1400_v30 = vmax.f32 %v1320_v18, %v1384_v45  ;;  %v5151_v14 = vld [vmem:[#allocation9_spill] sm:$0xff]  ;;  %v1872_v18 = vsel %vm1852_vm3, %v1844_v35, 0.0 }
 0x1fd   : > { %v1717_v2 = vpop.permute.xlu0 %1716  ;;  %v1284_v44 = vpop.permute.xlu1 %1283  ;;  %v1318_v58 = vmax.f32 %v5151_v14, %v1282_v42 }
 0x1fe   : > { %v1749_v41 = vmax.f32 %v1508_v11, %v4582_v37  ;;  %v1319_v22 = vmax.f32 %v4264_v8, %v1284_v44  ;;  %v1382_v37 = vmax.f32 %v5150_v3, %v1346_v23  ;;  %v1321_v23 = vmax.f32 %v5154_v34, %v4607_v40 }
 0x200   : > { %v1398_v25 = vmax.f32 %v1318_v58, %v1382_v37 }
 0x201   : > { %v1462_v5 = vpop.permute.xlu0 %1461  ;;  %v1348_v57 = vpop.permute.xlu1 %1347 }
 0x202   : > { %v1496_v54 = vmax.f32 %v4410_v1, %v1462_v5  ;;  %v1383_v61 = vmax.f32 %v4275_v0, %v1348_v57  ;;  %v1845_v1 = vmax.f32 %v1749_v41, %v4576_v26  ;;  %v1504_v57 = vmax.f32 %v4550_v47, %v1488_v31 }
 0x203   : > { %v1401_v5 = vmax.f32 %v1321_v23, %v1385_v62 }
 0x204   : > { %v1399_v29 = vmax.f32 %v1319_v22, %v1383_v61  ;;  %v1512_v0 = vmax.f32 %v1400_v30, %v1496_v54  ;;  %v2120_v26 = vrot.slane %v1845_v1, 1  ;;  %v1745_v42 = vmax.f32 %v1504_v57, %v4601_v60 }
 0x205   : > { %v1719_v43 = vpop.permute.xlu0 %1718  ;;  %v1456_v48 = vpop.permute.xlu1 %1455  ;;  %v1919_v61 = vsel %vm1899_vm4, %v1844_v35, 0.0  ;;  %v1489_v30 = vmax.f32 %v4347_v59, %v4605_v56 }
 0x206   : > { %v1493_v8 = vmax.f32 %v4333_v49, %v1456_v48  ;;  %v1511_v44 = vmax.f32 %v1399_v29, %v1495_v4  ;;  %v1753_v11 = vmax.f32 %v1512_v0, %v1719_v43 }
 0x208   : > { %v1509_v24 = vmax.f32 %v1397_v6, %v1493_v8  ;;  %v1752_v7 = vmax.f32 %v1511_v44, %v1717_v2  ;;  %v1920_v2 = vsel %vm1899_vm4, %v1845_v1, 0.0  ;;  %v1849_v22 = vmax.f32 %v1753_v11, %v4615_v51 }
 0x209   : > { %v1464_v28 = vpop.permute.xlu0 %1463  ;;  %v1458_v63 = vpop.permute.xlu1 %1457  ;;  %v1921_v29 = vadd.f32 %v1920_v2, %v1919_v61 }
 0x20a   : > { %v1750_v49 = vmax.f32 %v1509_v24, %v4603_v12  ;;  %v1494_v47 = vmax.f32 %v4361_v10, %v1458_v63  ;;  %v1497_v45 = vmax.f32 %v4429_v9, %v1464_v28  ;;  %v4652_v12 = vsel %vm1852_vm3, %v1845_v1, 0.0 }
 0x20b   : > { %v1848_v9 = vmax.f32 %v1752_v7, %v4609_v53  ;;  %v1874_v4 = vadd.f32 %v4652_v12, %v1872_v18  ;;  %v2124_v37 = vrot.slane %v1849_v22, 1  ;;  %v1928_v63 = vsel %vm1899_vm4, %v1849_v22, 0.0 }
 0x20c   : > { %v1846_v20 = vmax.f32 %v1750_v49, %v4580_v46  ;;  %v1510_v36 = vmax.f32 %v1398_v25, %v1494_v47  ;;  %v4657_v46 = vsel %vm1852_vm3, %v2120_v26, 0.0  ;;  %v1513_v38 = vmax.f32 %v1401_v5, %v1497_v45 }
 0x20d   : > { %v1721_v40 = vpop.permute.xlu0 %1720  ;;  %v4649_v41 = vpop.permute.xlu1 %1704  ;;  %v2161_v51 = vadd.f32 %v4657_v46, %v2159_v32  ;;  %v4689_v34 = vsel %vm1852_vm3, %v2124_v37, 0.0  ;;  %v4693_v49 = vsel %vm1852_vm3, %v1848_v9, 0.0 }
 0x20e   : > { %v1922_v10 = vsel %vm1899_vm4, %v1846_v20, 0.0  ;;  %v2121_v60 = vrot.slane %v1846_v20, 1  ;;  %v4663_v31 = vsel %vm1852_vm3, %v1846_v20, 0.0  ;;  %v1751_v16 = vmax.f32 %v1510_v36, %v4611_v33 }
 0x20f   : > { %v2693_v54 = vadd.f32 %v1922_v10, %v1920_v2  ;;  %v2123_v33 = vrot.slane %v1848_v9, 1  ;;  %v1876_v8 = vadd.f32 %v4663_v31, %v1874_v4  ;;  %v1923_v59 = vadd.f32 %v1922_v10, %v1921_v29 }
 0x210   : > { %v4672_v48 = vsel %vm1852_vm3, %v2121_v60, 0.0  ;;  %v1847_v6 = vmax.f32 %v1751_v16, %v4599_v55  ;;  %v1754_v0 = vmax.f32 %v1513_v38, %v1721_v40  ;;  %v1926_v55 = vsel %vm1899_vm4, %v1848_v9, 0.0 }
 0x211   : > { %v1817_v53 = vpop.permute.xlu0 %1816  ;;  %v1799_v43 = vpop.permute.xlu1 %1798  ;;  %v2163_v57 = vadd.f32 %v4672_v48, %v2161_v51  ;;  %v4696_v26 = vsel %vm1852_vm3, %v2123_v33, 0.0  ;;  %v1505_v10 = vmax.f32 %v4574_v13, %v1489_v30  ;;  %v5156_v33 = vld [vmem:[#allocation14_spill] sm:$0xff] }
 0x212   : > { %v1841_v3 = vmax.f32 %v1745_v42, %v1799_v43  ;;  %v4677_v56 = vsel %vm1852_vm3, %v1847_v6, 0.0  ;;  %v1924_v1 = vsel %vm1899_vm4, %v1847_v6, 0.0  ;;  %v2122_v44 = vrot.slane %v1847_v6, 1  ;;  %v5155_v43 = vld [vmem:[#allocation19_spill] sm:$0xff] }
 0x213   : > { %v1878_v14 = vadd.f32 %v4677_v56, %v1876_v8  ;;  %v1925_v58 = vadd.f32 %v1924_v1, %v1923_v59  ;;  %v1850_v21 = vmax.f32 %v1754_v0, %v1817_v53  ;;  %v2694_v62 = vadd.f32 %v2693_v54, %v1924_v1 }
 0x214   : > { %v4684_v35 = vsel %vm1852_vm3, %v2122_v44, 0.0  ;;  %v1862_v28 = vsel %vm1852_vm3, %v1841_v3, 0.0  ;;  %v1909_v45 = vsel %vm1899_vm4, %v1841_v3, 0.0  ;;  %v2117_v9 = vrot.slane %v1841_v3, 1 }
 0x215   : > { %v1290_v24 = vpop.permute.xlu0 %1289  ;;  %v1801_v15 = vpop.permute.xlu1 %1800  ;;  %v1927_v23 = vadd.f32 %v1926_v55, %v1925_v58  ;;  %v2165_v25 = vadd.f32 %v4684_v35, %v2163_v57  ;;  %v2695_v7 = vadd.f32 %v2694_v62, %v1926_v55  ;;  %v1863_v11 = vadd.f32 %v1862_v28, %v4586_v50  ;;  %v5159_v55 = vld [vmem:[#allocation17_spill] sm:$0xff] }
 0x216   : > { %v1880_v47 = vadd.f32 %v4693_v49, %v1878_v14  ;;  %v1930_v18 = vsel %vm1899_vm4, %v1850_v21, 0.0  ;;  %v2125_v36 = vrot.slane %v1850_v21, 1  ;;  %v1910_v2 = vadd.f32 %v1909_v45, %v4588_v27 }
 0x217   : > { %v1929_v42 = vadd.f32 %v1928_v63, %v1927_v23  ;;  %v2167_v20 = vadd.f32 %v4696_v26, %v2165_v25  ;;  %v2696_v40 = vadd.f32 %v2695_v7, %v1928_v63  ;;  %v4709_v54 = vsel %vm1852_vm3, %v1849_v22, 0.0  ;;  %v5160_v63 = vld [vmem:[#allocation8_spill] sm:$0xff] }
 0x218   : > { %v2575_v16 = vadd.f32 %v4590_v52, %v1862_v28  ;;  %v1746_v38 = vmax.f32 %v1505_v10, %v4649_v41  ;;  %v1882_v32 = vadd.f32 %v4709_v54, %v1880_v47  ;;  %v2149_v27 = vsel %vm1852_vm3, %v2117_v9, 0.0 }
 0x219   : > { %v1354_v17 = vpop.permute.xlu0 %1353  ;;  %v1274_v5 = vpop.permute.xlu1 %1273  ;;  %v4705_v60 = vadd.f32 %v1930_v18, %v1929_v42  ;;  %v2169_v50 = vadd.f32 %v4689_v34, %v2167_v20  ;;  %v2697_v61 = vadd.f32 %v2696_v40, %v1930_v18  ;;  %v4717_v29 = vsel %vm1852_vm3, %v2125_v36, 0.0 }
 0x21a   : > { %v2150_v53 = vadd.f32 %v2149_v27, %v4595_v19  ;;  %v2684_v22 = vadd.f32 %v4592_v39, %v1909_v45  ;;  %v2793_v51 = vadd.f32 %v5155_v43, %v2149_v27  ;;  %v4727_v6 = vsel %vm1852_vm3, %v1850_v21, 0.0  ;;  %v5157_v19 = vld [vmem:[#allocation13_spill] sm:$0xff]  ;;  %v5161_v45 = vld [vmem:[#allocation7_spill] sm:$0xff] }
 0x21b   : > { %v1932_v4 = vrot.slane %v4705_v60, 4  ;;  %v4724_v41 = vadd.f32 %v4717_v29, %v2169_v50  ;;  %v1842_v3 = vmax.f32 %v1746_v38, %v1801_v15  ;;  %v1386_v37 = vmax.f32 %v5156_v33, %v1354_v17 }
 0x21c   : > { %v4731_v8 = vadd.f32 %v4727_v6, %v1882_v32  ;;  %v5158_v1 = vmax.f32 %v5157_v19, 0.0  ;;  %v5162_v17 = vmax.f32 %v5161_v45, 0.0 }
 0x21d   : > { %v1466_v13 = vpop.permute.xlu0 %1465  ;;  %v1338_v30 = vpop.permute.xlu1 %1337  ;;  %v1933_v52 = vadd.f32 %v1932_v4, %v4705_v60  ;;  %v1864_v57 = vsel %vm1852_vm3, %v1842_v3, 0.0  ;;  %v1911_v14 = vsel %vm1899_vm4, %v1842_v3, 0.0  ;;  %v2118_v58 = vrot.slane %v1842_v3, 1 }
 0x21e   : > { %v1322_v39 = vmax.f32 %v5158_v1, %v1290_v24  ;;  %v1498_v21 = vmax.f32 %v5159_v55, %v1466_v13  ;;  %v2172_v15 = vrot.slane %v4724_v41, 4  ;;  %v4739_v62 = vadd.f32 %v1864_v57, %v1863_v11 }
 0x21f   : > { %v1934_v59 = vrot.slane %v1933_v52, 2  ;;  %v1912_v28 = vadd.f32 %v1911_v14, %v1910_v2  ;;  %v1378_v23 = vmax.f32 %v5160_v63, %v1338_v30  ;;  %v2151_v25 = vsel %vm1852_vm3, %v2118_v58, 0.0  ;;  %v5163_v2 = vld [vmem:[#allocation18_spill] sm:$0xff]  ;;  %v1898_v63 = vld [vmem:[%s5110_s3 + $0x38] sm:$0xff] }
 0x220   : > { %v4743_v7 = vadd.f32 %v2575_v16, %v1864_v57  ;;  %v4745_v24 = vadd.f32 %v2684_v22, %v1911_v14  ;;  %v1402_v47 = vmax.f32 %v1322_v39, %v1386_v37  ;;  %v1314_v18 = vmax.f32 %v5162_v17, %v1274_v5 }
 0x221   : > { %v1723_v44 = vpop.permute.xlu0 %1722  ;;  %v1450_v0 = vpop.permute.xlu1 %1449  ;;  %v1935_v42 = vadd.f32 %v1934_v59, %v1933_v52  ;;  %v1913_v20 = vrot.slane %v1912_v28, 4  ;;  %v4749_v36 = vadd.f32 %v2151_v25, %v2150_v53  ;;  %v4751_v40 = vadd.f32 %v2793_v51, %v2151_v25 }
 0x222   : > { %v1514_v11 = vmax.f32 %v1402_v47, %v1498_v21  ;;  %v1490_v10 = vmax.f32 %v5163_v2, %v1450_v0  ;;  %v1885_v16 = vrot.slane %v4731_v8, 4  ;;  %v2173_v32 = vadd.f32 %v2172_v15, %v4724_v41 }
 0x223   : > { %v1914_v50 = vadd.f32 %v1913_v20, %v1912_v28  ;;  %v1394_v4 = vmax.f32 %v1314_v18, %v1378_v23  ;;  %v2153_v30 = vrot.slane %v4749_v36, 4  ;;  %v1936_v5 = vrot.slane %v1935_v42, 1 }
 0x224   : > { %v1755_v27 = vmax.f32 %v1514_v11, %v1723_v44  ;;  %v1866_v53 = vrot.slane %v4739_v62, 4  ;;  %v1886_v52 = vadd.f32 %v1885_v16, %v4731_v8  ;;  %v2174_v3 = vrot.slane %v2173_v32, 2  ;;  %v1896_v11 = vld [vmem:[%s5110_s3 + $0x28] sm:$0xff] }
 0x225   : > { %v1819_v9 = vpop.permute.xlu0 %1818  ;;  %v1707_v38 = vpop.permute.xlu1 %1706  ;;  %v1915_v13 = vrot.slane %v1914_v50, 2  ;;  %v1506_v43 = vmax.f32 %v1394_v4, %v1490_v10  ;;  %v2154_v59 = vadd.f32 %v2153_v30, %v4749_v36  ;;  %v1937_v0 = vadd.f32 %v1936_v5, %v1935_v42  ;;  %v1897_v42 = vld [vmem:[%s5110_s3 + $0x30] sm:$0xff]  ;;  %v1894_v5 = vld [vmem:[%s5110_s3 + $0x18] sm:$0xff] }
 0x226   : > { %v4758_v22 = vmax.f32 %v1755_v27, %v1819_v9  ;;  %v1867_v1 = vadd.f32 %v1866_v53, %v4739_v62  ;;  %v1887_v57 = vrot.slane %v1886_v52, 2  ;;  %v2175_v14 = vadd.f32 %v2174_v3, %v2173_v32  ;;  %v1895_v9 = vld [vmem:[%s5110_s3 + $0x20] sm:$0xff] }
 0x227   : > { %v1916_v51 = vadd.f32 %v1915_v13, %v1914_v50  ;;  %v1747_v44 = vmax.f32 %v1506_v43, %v1707_v38  ;;  %v2155_v21 = vrot.slane %v2154_v59, 2  ;;  %v2584_v23 = vadd.f32 %v4663_v31, %v4652_v12 }
 0x228   : > { %v2372_v33 = vsel %vm1899_vm4, %v4758_v22, 0.0  ;;  %v1868_v25 = vrot.slane %v1867_v1, 2  ;;  %v2176_v45 = vrot.slane %v2175_v14, 1  ;;  %v5164_v17 = vmov 0.0  }
 0x229   : > { %v1917_v37 = vrot.slane %v1916_v51, 1  ;;  %v1803_v19 = vpop.permute.xlu1 %1802  ;;  %v2698_v39 = vadd.f32 %v2697_v61, %v2372_v33  ;;  %v2373_v15 = vadd.f32 %v2372_v33, %v4705_v60  ;;  %v2585_v20 = vadd.f32 %v2584_v23, %v4677_v56 }
 0x22a   : > { %v4765_v55 = vmax.f32 %v1747_v44, %v1803_v19  ;;  %v1888_v12 = vadd.f32 %v1887_v57, %v1886_v52  ;;  %v2156_v31 = vadd.f32 %v2155_v21, %v2154_v59  ;;  %v1869_v56 = vadd.f32 %v1868_v25, %v1867_v1  ;;  %v1892_v44 = vld [vmem:[%s5110_s3 + $0x8] sm:$0xff] }
 0x22b   : > { %v1918_v58 = vadd.f32 %v1917_v37, %v1916_v51  ;;  %v2699_v61 = vrot.slane %v2698_v39, 4  ;;  %v2374_v18 = vrot.slane %v2373_v15, 4  ;;  %v2586_v38 = vadd.f32 %v2585_v20, %v4693_v49  ;;  %v3147_v25 = vld [vmem:[%s5110_s3 + $0x128] sm:$0xff] }
 0x22c   : > { %v2364_v60 = vsel %vm1899_vm4, %v4765_v55, 0.0  ;;  %v2263_v50 = vsel %vm1852_vm3, %v4765_v55, 0.0  ;;  %v2177_v32 = vadd.f32 %v2176_v45, %v2175_v14  ;;  %v1889_v4 = vrot.slane %v1888_v12, 1 }
 0x22d   : > { %v1950_v47 = vsel %vm1949_vm6, %v1937_v0, %v1918_v58  ;;  %v2700_v2 = vadd.f32 %v2699_v61, %v2698_v39  ;;  %v2365_v10 = vadd.f32 %v2364_v60, %v1912_v28  ;;  %v2271_v28 = vsel %vm1852_vm3, %v4758_v22, 0.0 }
 0x22e   : > { %3293 = vmatmul.mubr.msk.f32.vlgmr.msra.gmra.mxu1 %vm1899_vm4, %v1950_v47  ;;  %v2375_v27 = vadd.f32 %v2374_v18, %v2373_v15  ;;  %v2686_v13 = vadd.f32 %v4745_v24, %v2364_v60  ;;  %v2157_v30 = vrot.slane %v2156_v31, 1  ;;  %v2264_v49 = vadd.f32 %v2263_v50, %v4739_v62  ;;  %v1893_v24 = vld [vmem:[%s5110_s3 + $0x10] sm:$0xff]  ;;  %v3149_v62 = vld [vmem:[%s5110_s3 + $0x138] sm:$0xff]  ;;  %v1891_v15 = vld [vmem:[%s5110_s3] sm:$0xff] }
 0x22f   : > { %3296 = vmatpush3.msra.mxu1 %v1898_v63  ;;  %3311 = vmatprep.mubr.msk.f32.mxu1 %vm3690_vm5, %v5164_v17  ;;  %v2366_v16 = vrot.slane %v2365_v10, 4  ;;  %v2701_v53 = vrot.slane %v2700_v2, 2  ;;  %v1870_v51 = vrot.slane %v1869_v56, 1  ;;  %v2587_v33 = vadd.f32 %v2586_v38, %v4709_v54 }
 0x230   : > { %3297 = vmatprep.subr.mxu1 %v5164_v17  ;;  %v2687_v52 = vrot.slane %v2686_v13, 4  ;;  %v2158_v3 = vadd.f32 %v2157_v30, %v2156_v31  ;;  %v2272_v37 = vadd.f32 %v2271_v28, %v4731_v8  ;;  %v2376_v19 = vrot.slane %v2375_v27, 2  ;;  %v3148_v8 = vld [vmem:[%s5110_s3 + $0x130] sm:$0xff] }
 0x231   : > { %3298 = vmatpush3.msra.mxu1 %v1897_v42  ;;  %v2367_v43 = vadd.f32 %v2366_v16, %v2365_v10  ;;  %v2702_v0 = vadd.f32 %v2701_v53, %v2700_v2  ;;  %v2265_v54 = vrot.slane %v2264_v49, 4  ;;  %v1871_v57 = vadd.f32 %v1870_v51, %v1869_v56  ;;  %v3145_v2 = vld [vmem:[%s5110_s3 + $0x118] sm:$0xff]  ;;  %v3139_v10 = vld [vmem:[%s5110_s3 + $0xf0] sm:$0xff] }
 0x232   : > { %3299 = vmatprep.subr.mxu1 %v5164_v17  ;;  %v2688_v1 = vadd.f32 %v2687_v52, %v2686_v13  ;;  %v2189_v39 = vsel %vm1949_vm6, %v2177_v32, %v2158_v3  ;;  %v1890_v14 = vadd.f32 %v1889_v4, %v1888_v12  ;;  %v2588_v63 = vadd.f32 %v2587_v33, %v4727_v6  ;;  %v3146_v6 = vld [vmem:[%s5110_s3 + $0x120] sm:$0xff]  ;;  %v3140_v12 = vld [vmem:[%s5110_s3 + $0xf8] sm:$0xff]  ;;  %v3144_v4 = vld [vmem:[%s5110_s3 + $0x110] sm:$0xff] }
 0x233   : > { %3300 = vmatpush3.msra.mxu1 %v1896_v11  ;;  %v2368_v59 = vrot.slane %v2367_v43, 2  ;;  %3331 = vmatmul.mubr.msk.f32.vlgmr.msra.gmra.mxu0 %vm1899_vm4, %v2189_v39  ;;  %v2273_v23 = vrot.slane %v2272_v37, 4  ;;  %v2377_v61 = vadd.f32 %v2376_v19, %v2375_v27  ;;  %v2577_v47 = vadd.f32 %v4743_v7, %v2263_v50  ;;  %v3142_v52 = vld [vmem:[%s5110_s3 + $0x100] sm:$0xff] }
 0x234   : > { %3301 = vmatprep.subr.mxu1 %v5164_v17  ;;  %v2689_v21 = vrot.slane %v2688_v1, 2  ;;  %3353 = vmatpush3.msra.mxu0 %v3149_v62  ;;  %v2703_v20 = vrot.slane %v2702_v0, 1  ;;  %v2266_v60 = vadd.f32 %v2265_v54, %v2264_v49  ;;  %v2025_v45 = vsel %vm1949_vm6, %v1890_v14, %v1871_v57  ;;  %v3167_v62 = vld [vmem:[%s5110_s3 + $0x1b8] sm:$0xff]  ;;  %v3165_v14 = vld [vmem:[%s5110_s3 + $0x1a8] sm:$0xff] }
 0x235   : > { %3302 = vmatpush3.msra.mxu1 %v1895_v9  ;;  %v2369_v58 = vadd.f32 %v2368_v59, %v2367_v43  ;;  %3354 = vmatprep.subr.mxu0 %v5164_v17  ;;  %v2589_v7 = vadd.f32 %v2588_v63, %v2271_v28  ;;  %v2274_v11 = vadd.f32 %v2273_v23, %v2272_v37  ;;  %v2378_v50 = vrot.slane %v2377_v61, 1 }
 0x236   : > { %3303 = vmatprep.subr.mxu1 %v5164_v17  ;;  %v2690_v42 = vadd.f32 %v2689_v21, %v2688_v1  ;;  %3355 = vmatpush3.msra.mxu0 %v3148_v8  ;;  %v2802_v56 = vadd.f32 %v4672_v48, %v4657_v46  ;;  %v2578_v9 = vrot.slane %v2577_v47, 4  ;;  %v2267_v16 = vrot.slane %v2266_v60, 2  ;;  %v3138_v48 = vld [vmem:[%s5110_s3 + $0xe8] sm:$0xff] }
 0x237   : > { %3304 = vmatpush3.msra.mxu1 %v1894_v5  ;;  %3356 = vmatprep.subr.mxu0 %v5164_v17  ;;  %v2370_v31 = vrot.slane %v2369_v58, 1  ;;  %v2467_v32 = vrot.slane %v4765_v55, 1  ;;  %v2704_v28 = vadd.f32 %v2703_v20, %v2702_v0  ;;  %v2590_v46 = vrot.slane %v2589_v7, 4  ;;  %v3143_v5 = vld [vmem:[%s5110_s3 + $0x108] sm:$0xff]  ;;  %v3135_v0 = vld [vmem:[%s5110_s3 + $0xd0] sm:$0xff] }
 0x238   : > { %3305 = vmatprep.subr.mxu1 %v5164_v17  ;;  %v2691_v18 = vrot.slane %v2690_v42, 1  ;;  %3357 = vmatpush3.msra.mxu0 %v3147_v25  ;;  %v2803_v27 = vadd.f32 %v2802_v56, %v4684_v35  ;;  %v2275_v55 = vrot.slane %v2274_v11, 2  ;;  %v2468_v30 = vrot.slane %v4758_v22, 1  ;;  %v3137_v22 = vld [vmem:[%s5110_s3 + $0xe0] sm:$0xff] }
 0x239   : > { %3306 = vmatpush3.msra.mxu1 %v1893_v24  ;;  %3358 = vmatprep.subr.mxu0 %v5164_v17  ;;  %v2371_v13 = vadd.f32 %v2370_v31, %v2369_v58  ;;  %v2579_v53 = vadd.f32 %v2578_v9, %v2577_v47  ;;  %v2379_v49 = vadd.f32 %v2378_v50, %v2377_v61  ;;  %v2471_v51 = vsel %vm1852_vm3, %v2467_v32, 0.0  ;;  %v3134_v58 = vld [vmem:[%s5110_s3 + $0xc8] sm:$0xff]  ;;  %v3160_v9 = vld [vmem:[%s5110_s3 + $0x180] sm:$0xff] }
 0x23a   : > { %3307 = vmatprep.subr.mxu1 %v5164_v17  ;;  %3359 = vmatpush3.msra.mxu0 %v3146_v6  ;;  %v2692_v38 = vadd.f32 %v2691_v18, %v2690_v42  ;;  %v2268_v43 = vadd.f32 %v2267_v16, %v2266_v60  ;;  %v2804_v3 = vadd.f32 %v2803_v27, %v4696_v26  ;;  %v2479_v59 = vsel %vm1852_vm3, %v2468_v30, 0.0  ;;  %v3136_v26 = vld [vmem:[%s5110_s3 + $0xd8] sm:$0xff] }
 0x23b   : > { %3308 = vmatpush3.msra.mxu1 %v1892_v44  ;;  %3360 = vmatprep.subr.mxu0 %v5164_v17  ;;  %v2591_v24 = vadd.f32 %v2590_v46, %v2589_v7  ;;  %v2391_v33 = vsel %vm1949_vm6, %v2379_v49, %v2371_v13  ;;  %v2276_v37 = vadd.f32 %v2275_v55, %v2274_v11  ;;  %v2580_v1 = vrot.slane %v2579_v53, 2  ;;  %v3166_v44 = vld [vmem:[%s5110_s3 + $0x1b0] sm:$0xff]  ;;  %v3163_v42 = vld [vmem:[%s5110_s3 + $0x198] sm:$0xff]  ;;  %v3161_v11 = vld [vmem:[%s5110_s3 + $0x188] sm:$0xff] }
 0x23c   : > { %3309 = vmatprep.subr.mxu1 %v5164_v17  ;;  %3361 = vmatpush3.msra.mxu0 %v3145_v2  ;;  %v4867_v35 = vsel %vm1949_vm6, %v2704_v28, %v2692_v38  ;;  %v2472_v19 = vadd.f32 %v2471_v51, %v4749_v36  ;;  %v2269_v39 = vrot.slane %v2268_v43, 1  ;;  %v2805_v54 = vadd.f32 %v2804_v3, %v4689_v34  ;;  %v3157_v2 = vld [vmem:[%s5110_s3 + $0x170] sm:$0xff]  ;;  %v3185_v28 = vld [vmem:[%s5110_s3 + $0x238] sm:$0xff]  ;;  %v3155_v13 = vld [vmem:[%s5110_s3 + $0x160] sm:$0xff] }
 0x23d   : > { %3310 = vmatpush3.msra.mxu1 %v1891_v15  ;;  %3362 = vmatprep.subr.mxu0 %v5164_v17  ;;  %v2480_v36 = vadd.f32 %v2479_v59, %v4724_v41  ;;  %v2592_v8 = vrot.slane %v2591_v24, 2  ;;  %v2277_v57 = vrot.slane %v2276_v37, 1  ;;  %v2581_v34 = vadd.f32 %v2580_v1, %v2579_v53  ;;  %v3164_v41 = vld [vmem:[%s5110_s3 + $0x1a0] sm:$0xff]  ;;  %v3184_v55 = vld [vmem:[%s5110_s3 + $0x230] sm:$0xff]  ;;  %v3154_v53 = vld [vmem:[%s5110_s3 + $0x158] sm:$0xff] }
 0x23e   : > { %3312 = vmatmul.mubr.msk.f32.vlgmr.msra.gmra.mxu1 %vm1899_vm4, %v2025_v45  ;;  %3333 = vmatprep.subr.mxu1 %v5164_v17  ;;  %v2473_v21 = vrot.slane %v2472_v19, 4  ;;  %v3133_v15 = vld [vmem:[%s5110_s3 + $0xc0] sm:$0xff]  ;;  %v2270_v63 = vadd.f32 %v2269_v39, %v2268_v43  ;;  %v2806_v23 = vadd.f32 %v2805_v54, %v4717_v29  ;;  %v2795_v47 = vadd.f32 %v4751_v40, %v2471_v51  ;;  %v3162_v29 = vld [vmem:[%s5110_s3 + $0x190] sm:$0xff]  ;;  %v3183_v49 = vld [vmem:[%s5110_s3 + $0x228] sm:$0xff] }
 0x23f   : > { %3334 = vmatpush3.msra.mxu1 %v3140_v12  ;;  %3363 = vmatpush3.msra.mxu0 %v3144_v4  ;;  %v2481_v25 = vrot.slane %v2480_v36, 4  ;;  %v2593_v61 = vadd.f32 %v2592_v8, %v2591_v24  ;;  %v2278_v20 = vadd.f32 %v2277_v57, %v2276_v37  ;;  %v2582_v45 = vrot.slane %v2581_v34, 1  ;;  %v3158_v12 = vld [vmem:[%s5110_s3 + $0x178] sm:$0xff]  ;;  %v3156_v4 = vld [vmem:[%s5110_s3 + $0x168] sm:$0xff]  ;;  %v3153_v51 = vld [vmem:[%s5110_s3 + $0x150] sm:$0xff] }
 0x240   : > { %3335 = vmatprep.subr.mxu1 %v5164_v17  ;;  %3368 = vmatprep.mubr.msk.f32.mxu0 %vm3690_vm5, %v5164_v17  ;;  %v2807_v60 = vadd.f32 %v2806_v23, %v2479_v59  ;;  %v2474_v6 = vadd.f32 %v2473_v21, %v2472_v19  ;;  %v2796_v18 = vrot.slane %v2795_v47, 4  ;;  %v3181_v37 = vld [vmem:[%s5110_s3 + $0x218] sm:$0xff]  ;;  %v3180_v19 = vld [vmem:[%s5110_s3 + $0x210] sm:$0xff]  ;;  %v3179_v54 = vld [vmem:[%s5110_s3 + $0x208] sm:$0xff] }
 0x241   : > { %3336 = vmatpush3.msra.mxu1 %v3139_v10  ;;  %3364 = vmatprep.subr.mxu0 %v5164_v17  ;;  %v2290_v40 = vsel %vm1949_vm6, %v2278_v20, %v2270_v63  ;;  %v2482_v7 = vadd.f32 %v2481_v25, %v2480_v36  ;;  %v2594_v31 = vrot.slane %v2593_v61, 1  ;;  %v2583_v50 = vadd.f32 %v2582_v45, %v2581_v34  ;;  %v3175_v8 = vld [vmem:[%s5110_s3 + $0x1f0] sm:$0xff]  ;;  %v3178_v57 = vld [vmem:[%s5110_s3 + $0x200] sm:$0xff]  ;;  %v3174_v21 = vld [vmem:[%s5110_s3 + $0x1e8] sm:$0xff] }
 0x242   : > { %3337 = vmatprep.subr.mxu1 %v5164_v17  ;;  %3365 = vmatpush3.msra.mxu0 %v3143_v5  ;;  %v2808_v10 = vrot.slane %v2807_v60, 4  ;;  %v2475_v56 = vrot.slane %v2474_v6, 2  ;;  %v2797_v16 = vadd.f32 %v2796_v18, %v2795_v47  ;;  %v3171_v63 = vld [vmem:[%s5110_s3 + $0x1d0] sm:$0xff]  ;;  %v3170_v23 = vld [vmem:[%s5110_s3 + $0x1c8] sm:$0xff]  ;;  %v3169_v25 = vld [vmem:[%s5110_s3 + $0x1c0] sm:$0xff] }
 0x243   : > { %3338 = vmatpush3.msra.mxu1 %v3138_v48  ;;  %3366 = vmatprep.subr.mxu0 %v5164_v17  ;;  %v2483_v38 = vrot.slane %v2482_v7, 2  ;;  %v2595_v32 = vadd.f32 %v2594_v31, %v2593_v61 }
 0x244   : > { %3339 = vmatprep.subr.mxu1 %v5164_v17  ;;  %3367 = vmatpush3.msra.mxu0 %v3142_v52  ;;  %v2809_v27 = vadd.f32 %v2808_v10, %v2807_v60  ;;  %v2476_v46 = vadd.f32 %v2475_v56, %v2474_v6  ;;  %v2798_v5 = vrot.slane %v2797_v16, 2  ;;  %v3182_v52 = vld [vmem:[%s5110_s3 + $0x220] sm:$0xff] }
 0x245   : > { %3340 = vmatpush3.msra.mxu1 %v3137_v22  ;;  %3390 = vmatprep.subr.mxu0 %v5164_v17  ;;  %v2607_v48 = vsel %vm1949_vm6, %v2595_v32, %v2583_v50  ;;  %v2484_v30 = vadd.f32 %v2483_v38, %v2482_v7  ;;  %v3691_v38 = vmov 1966171168  }
 0x246   : > { %3341 = vmatprep.subr.mxu1 %v5164_v17  ;;  %3369 = vmatmul.mubr.msk.f32.vlgmr.msra.gmra.mxu0 %vm1899_vm4, %v2391_v33  ;;  %v2810_v22 = vrot.slane %v2809_v27, 2  ;;  %v2477_v43 = vrot.slane %v2476_v46, 1  ;;  %v2799_v3 = vadd.f32 %v2798_v5, %v2797_v16  ;;  %v3152_v33 = vld [vmem:[%s5110_s3 + $0x148] sm:$0xff]  ;;  %v2910_v16 = vunpack.c.l.s4 %v3691_v38 }
 0x247   : > { %3391 = vmatpush3.msra.mxu0 %v3167_v62  ;;  %3342 = vmatpush3.msra.mxu1 %v3136_v26  ;;  %v2485_v24 = vrot.slane %v2484_v30, 1  ;;  %v3151_v26 = vld [vmem:[%s5110_s3 + $0x140] sm:$0xff] }
 0x248   : > { %3392 = vmatprep.subr.mxu0 %v5164_v17  ;;  %3343 = vmatprep.subr.mxu1 %v5164_v17  ;;  %v2811_v59 = vadd.f32 %v2810_v22, %v2809_v27  ;;  %v2478_v62 = vadd.f32 %v2477_v43, %v2476_v46  ;;  %v2800_v39 = vrot.slane %v2799_v3, 1  ;;  %v2911_v27 = vunpack.c.0.s8 %v2910_v16 }
 0x249   : > { %3393 = vmatpush3.msra.mxu0 %v3166_v44  ;;  %3344 = vmatpush3.msra.mxu1 %v3135_v0  ;;  %v2486_v1 = vadd.f32 %v2485_v24, %v2484_v30  ;;  %v3176_v0 = vld [vmem:[%s5110_s3 + $0x1f8] sm:$0xff]  ;;  %v5165_v30 = vld [vmem:[#allocation6_spill] sm:$0xff] }
 0x24a   : > { %3394 = vmatprep.subr.mxu0 %v5164_v17  ;;  %3345 = vmatprep.subr.mxu1 %v5164_v17  ;;  %v2812_v36 = vrot.slane %v2811_v59, 1  ;;  %v2914_v5 = vsub.s32 %v2911_v27, %v5165_v30 }
 0x24b   : > { %3395 = vmatpush3.msra.mxu0 %v3165_v14  ;;  %3346 = vmatpush3.msra.mxu1 %v3134_v58  ;;  %v2498_v44 = vsel %vm1949_vm6, %v2486_v1, %v2478_v62  ;;  %v2801_v14 = vadd.f32 %v2800_v39, %v2799_v3 }
 0x24c   : > { %3396 = vmatprep.subr.mxu0 %v5164_v17  ;;  %3347 = vmatprep.subr.mxu1 %v5164_v17  ;;  %v2813_v58 = vadd.f32 %v2812_v36, %v2811_v59 }
 0x24d   : > { %3397 = vmatpush3.msra.mxu0 %v3164_v41  ;;  %3348 = vmatpush3.msra.mxu1 %v3133_v15  ;;  %v3173_v41 = vld [vmem:[%s5110_s3 + $0x1e0] sm:$0xff]  ;;  %v3172_v15 = vld [vmem:[%s5110_s3 + $0x1d8] sm:$0xff] }
 0x24e   : > { %3398 = vmatprep.subr.mxu0 %v5164_v17  ;;  %3349 = vmatprep.mubr.msk.f32.mxu1 %vm3690_vm5, %v5164_v17  ;;  %v2825_v34 = vsel %vm1949_vm6, %v2813_v58, %v2801_v14 }
 0x24f   : > { %3399 = vmatpush3.msra.mxu0 %v3163_v42  ;;  %3350 = vmatmul.mubr.msk.f32.vlgmr.msra.gmra.mxu1 %vm1899_vm4, %v2290_v40 }
 0x250   : > { %3400 = vmatprep.subr.mxu0 %v5164_v17  ;;  %3371 = vmatprep.subr.mxu1 %v5164_v17 }
 0x251   : > { %3401 = vmatpush3.msra.mxu0 %v3162_v29  ;;  %3372 = vmatpush3.msra.mxu1 %v3158_v12 }
 0x252   : > { %3402 = vmatprep.subr.mxu0 %v5164_v17  ;;  %3373 = vmatprep.subr.mxu1 %v5164_v17 }
 0x253   : > { %3403 = vmatpush3.msra.mxu0 %v3161_v11  ;;  %3374 = vmatpush3.msra.mxu1 %v3157_v2 }
 0x254   : > { %3404 = vmatprep.subr.mxu0 %v5164_v17  ;;  %3406 = vmatprep.mubr.msk.f32.mxu0 %vm3690_vm5, %v5164_v17 }
 0x255   : > { %3405 = vmatpush3.msra.mxu0 %v3160_v9  ;;  %3375 = vmatprep.subr.mxu1 %v5164_v17 }
 0x256   : > { %3407 = vmatmul.mubr.msk.f32.vlgmr.msra.gmra.mxu0 %vm1899_vm4, %v2607_v48  ;;  %3428 = vmatprep.subr.mxu0 %v5164_v17 }
 0x257   : > { %3376 = vmatpush3.msra.mxu1 %v3156_v4  ;;  %3429 = vmatpush3.msra.mxu0 %v3185_v28 }
 0x258   : > { %3377 = vmatprep.subr.mxu1 %v5164_v17  ;;  %3430 = vmatprep.subr.mxu0 %v5164_v17 }
 0x259   : > { %3378 = vmatpush3.msra.mxu1 %v3155_v13  ;;  %3431 = vmatpush3.msra.mxu0 %v3184_v55  ;;  %v3187_v13 = vld [vmem:[%s5111_s4] ss:$0 sm:$0xff] }
 0x25a   : > { %3379 = vmatprep.subr.mxu1 %v5164_v17  ;;  %3432 = vmatprep.subr.mxu0 %v5164_v17 }
 0x25b   : > { %3380 = vmatpush3.msra.mxu1 %v3154_v53  ;;  %3433 = vmatpush3.msra.mxu0 %v3183_v49 }
 0x25c   : > { %3381 = vmatprep.subr.mxu1 %v5164_v17  ;;  %3434 = vmatprep.subr.mxu0 %v5164_v17 }
 0x25d   : > { %3382 = vmatpush3.msra.mxu1 %v3153_v51  ;;  %3435 = vmatpush3.msra.mxu0 %v3182_v52 }
 0x25e   : > { %3383 = vmatprep.subr.mxu1 %v5164_v17  ;;  %3436 = vmatprep.subr.mxu0 %v5164_v17 }
 0x25f   : > { %3384 = vmatpush3.msra.mxu1 %v3152_v33  ;;  %3437 = vmatpush3.msra.mxu0 %v3181_v37 }
 0x260   : > { %3385 = vmatprep.subr.mxu1 %v5164_v17  ;;  %3438 = vmatprep.subr.mxu0 %v5164_v17 }
 0x261   : > { %3386 = vmatpush3.msra.mxu1 %v3151_v26  ;;  %3387 = vmatprep.mubr.msk.f32.mxu1 %vm3690_vm5, %v5164_v17 }
 0x262   : > { %3439 = vmatpush3.msra.mxu0 %v3180_v19  ;;  %3388 = vmatmul.mubr.msk.f32.vlgmr.msra.gmra.mxu1 %vm1899_vm4, %v2498_v44 }
 0x263   : > { %3409 = vmatprep.subr.mxu1 %v5164_v17  ;;  %3440 = vmatprep.subr.mxu0 %v5164_v17 }
 0x264   : > { %3410 = vmatpush3.msra.mxu1 %v3176_v0  ;;  %3441 = vmatpush3.msra.mxu0 %v3179_v54 }
 0x265   : > { %3411 = vmatprep.subr.mxu1 %v5164_v17  ;;  %3442 = vmatprep.subr.mxu0 %v5164_v17 }
 0x266   : > { %3412 = vmatpush3.msra.mxu1 %v3175_v8  ;;  %3443 = vmatpush3.msra.mxu0 %v3178_v57 }
 0x267   : > { %3444 = vmatprep.mubr.msk.f32.mxu0 %vm3690_vm5, %v5164_v17  ;;  %3413 = vmatprep.subr.mxu1 %v5164_v17 }
 0x268   : > { %3445 = vmatmul.mubr.msk.f32.vlgmr.msra.gmra.mxu0 %vm1899_vm4, %v2825_v34  ;;  %3414 = vmatpush3.msra.mxu1 %v3174_v21 }
 0x269   : > { %3415 = vmatprep.subr.mxu1 %v5164_v17  ;;  %3425 = vmatprep.mubr.msk.f32.mxu1 %vm3690_vm5, %v5164_v17 }
 0x26a   : > { %3416 = vmatpush3.msra.mxu1 %v3173_v41 }
 0x26b   : > { %3417 = vmatprep.subr.mxu1 %v5164_v17 }
 0x26c   : > { %3418 = vmatpush3.msra.mxu1 %v3172_v15 }
 0x26d   : > { %3419 = vmatprep.subr.mxu1 %v5164_v17 }
 0x26e   : > { %3420 = vmatpush3.msra.mxu1 %v3171_v63 }
 0x26f   : > { %3421 = vmatprep.subr.mxu1 %v5164_v17 }
 0x270   : > { %3422 = vmatpush3.msra.mxu1 %v3170_v23 }
 0x271   : > { %3423 = vmatprep.subr.mxu1 %v5164_v17 }
 0x272   : > { %3424 = vmatpush3.msra.mxu1 %v3169_v25 }
 0x273   : > { %3426 = vmatmul.mubr.msk.f32.vlgmr.msra.gmra.mxu1 %vm1899_vm4, %v4867_v35 }
 0x2ee   : > { %v2019_v61 = vpop.f32.mrf.mxu1 }
 0x2f0   : > { %v3294_v47 = vpop.f32.mrf.mxu1 }
 0x2f3   : > { %v2258_v42 = vpop.f32.mrf.mxu0 }
 0x2f5   : > { %v3332_v20 = vpop.f32.mrf.mxu0 }
 0x2fe   : > { %v2094_v60 = vpop.f32.mrf.mxu1 }
 0x2ff   : > { %v2095_v18 = vadd.f32 %v2094_v60, %v2019_v61 }
 0x300   : > { %v3313_v6 = vpop.f32.mrf.mxu1 }
 0x301   : > { %v2262_v2 = vadd.f32 %v2258_v42, %v2095_v18 }
 0x306   : > { %v2460_v45 = vpop.f32.mrf.mxu0 }
 0x308   : > { %v3370_v29 = vpop.f32.mrf.mxu0 }
 0x30f   : > { %v2359_v40 = vpop.f32.mrf.mxu1 }
 0x310   : > { %v2363_v10 = vadd.f32 %v2359_v40, %v2262_v2 }
 0x311   : > { %v3351_v12 = vpop.f32.mrf.mxu1 }
 0x312   : > { %v2464_v50 = vadd.f32 %v2460_v45, %v2363_v10 }
 0x316   : > { %v2676_v7 = vpop.f32.mrf.mxu0 }
 0x318   : > { %v3408_v31 = vpop.f32.mrf.mxu0 }
 0x322   : > { %v2567_v11 = vpop.f32.mrf.mxu1 }
 0x323   : > { %v2571_v9 = vadd.f32 %v2567_v11, %v2464_v50 }
 0x324   : > { %v3389_v17 = vpop.f32.mrf.mxu1 }
 0x325   : > { %v2680_v32 = vadd.f32 %v2676_v7, %v2571_v9 }
 0x328   : > { %v2894_v56 = vpop.f32.mrf.mxu0 }
 0x32a   : > { %v3446_v35 = vpop.f32.mrf.mxu0 }
 0x333   : > { %v2785_v4 = vpop.f32.mrf.mxu1 }
 0x334   : > { %v2789_v28 = vadd.f32 %v2785_v4, %v2680_v32 }
 0x335   : > { %v3427_v46 = vpop.f32.mrf.mxu1 }
 0x336   : > { %v2898_v48 = vadd.f32 %v2894_v56, %v2789_v28 }
 0x338   : > { %v2899_v55 = vmul.f32 0.015625, %v2898_v48 }
 0x33a   : > { %v2907_v53 = vadd.f32 %v3187_v13, %v2899_v55 }
 0x33c   : > { %v2915_v49 = vrot.slane %v2907_v53, %v2914_v5 }
 0x33e   : > { %v2916_v22 = vcombine.high %v2915_v49, %v2915_v49  ;;  %v2923_v43 = vrot.slane %v2915_v49, %v2914_v5 }
 0x340   : > { %v2930_v51 = vrot.slane %v2916_v22, %v2914_v5  ;;  %2934 = vst.msk [vmem:[%s220_s23] sm:$0x1] %vm2933_vm7, %v2923_v43 }
 0x342   : > { %2935 = vst.msk [vmem:[%s220_s23 + $0x1] sm:$0x1] %vm2933_vm7, %v2930_v51 }
 0x343   : > { %3639 = shalt.err (!%p3636_p3)
}
 0x344   : > { %s3640_s11 = scalar_lea.hbm %s5063_s6, 32  ;;  %s3644_s12 = scalar_lea.hbm %s5112_s5, 64 }
 0x345   : > { %p3641_p4 = scmp.ne.s32.totalorder %s5063_s6, %s3640_s11  ;;  %p3645_p9 = scmp.lt.s32.totalorder %s5063_s6, %s5112_s5 }
 0x346   : > { %p3646_p10 = scmp.lt.s32.totalorder %s3644_s12, %s3640_s11 }
 0x347   : > { %p3642_p7 = pnand %p3641_p4, %p3763_p5 }
 0x348   : > { %p3647_p11 = por %p3646_p10, %p3645_p9 }
 0x349   : > { %p3643_p8 = pneg %p3642_p7 }
 0x34b   : > { %p3648_p12 = pnand %p3647_p11, %p3643_p8 }
 0x34d   : > { %3651 = shalt.err (!%p3648_p12)
}
 0x34e   : > { %s3693_s17 = smov 16   ;;  %s3694_s23 = smov 1  }
 0x34f   : > { %3447 = dma.vmem_to_hbm [thread:$0]  (%p3763_p5), %s5065_s26, 32, %s5063_s6, %s5067_s7, %s3693_s17, %s3693_s17, %s3694_s23  }
 0x350 PF: > { %p3453_p13 = scmp.ge.s32.totalorder %s3686_s21, 2  ;;  %s2965_s30 = sand.u32 1, %s3674_s18  }
 0x351   : > { %s2966_s25 = scalar_lea.sflag [#allocation4], %s2965_s30 }
 0x352   : > { %p3450_p0 = pnand %p3453_p13, %p3767_p6 }
 0x354   : > { %p3451_p1 = pneg %p3450_p0 }
 0x356   : > { %3669 = dma.done.wait (%p3451_p1), %s2966_s25, 32  }
 0x357   : > { %3671 = vsyncadd (%p3451_p1), %s2966_s25, 4294967264  ;;  %p15_p2 = scmp.ge.s32.totalorder %s3750_s24, 4   ;;  %s5166_s18 = smov %s3678_s19 }
 0x358   : > { %s5167_s19 = smov %s3682_s20  ;;  %s5168_s20 = smov %s3761_s27 }
 0x359   : > { %s5169_s21 = smov %s3750_s24  ;;  %17 = sbr.rel (!%p15_p2) target bundleno = 3 (0x3), region = 101 }
 0x35e   :  { %2971 = vsyncpa [#allocation4], 1 }
 0x35f   :  { %2973 = vsyncpa [#allocation4 + $0x1], 1 }

</bundles_post_ra>
